<compile_context>
chip_gen: v7x
topology: tpu7x:2x2x1
jax: 0.10.0
libtpu: 0.0.40
codegen_flags: <defaults>
</compile_context>

<pallas_src>
import functools

import jax
import jax.numpy as jnp
from jax.experimental import pallas as pl
from jax.experimental.pallas import tpu as pltpu

_HIGHEST = jax.lax.Precision.HIGHEST


def _vmem_capacity_bytes():
    """Physical VMEM per core (trace-time query); conservative v7x default on failure."""
    try:
        cap = int(pltpu.get_tpu_info().vmem_capacity_bytes)
        if cap > 0:
            return cap
    except Exception:
        pass
    return 64 << 20


# ----------------------------------------------------------------------------- kernels


def _nfap_fused_kernel(x_ref, w1g_ref, b1_ref, w2g_ref, b2g_ref,
                       wd00_ref, wd01_ref, wd10_ref, wd11_ref, bd_ref,
                       me_ref, sel_ref, o_ref, *, W):
    """Single-pass kernel, one batch element per grid step.

    x_ref : (1, S, 2W)   S = C*Ho; row s = c*Ho + i, lane l = di*W + w  (free NCHW view)
    w1g   : (C8, S)      w1[k, c(s)] / (H*W)  -> pool folded into the first 1x1 conv
    b1    : (C8, 1)
    w2g   : (S, C8)      w2[c(s), k]          -> attention lands directly per-row
    b2g   : (S, 1)
    wd??  : (S, 1)       depthwise tap wd[c(s), di, dj]
    bd    : (S, 1)       depthwise bias bd[c(s)]
    me    : (1, W)       even-lane (dj == 0) mask
    sel   : (W, Wo)      0/1 pair-sum matrix: sel[w, j] = (w // 2 == j)
    o_ref : (1, S, Wo)
    """
    xb = x_ref[0]                                          # (S, 2W)
    x_e = xb[:, :W]                                        # rows 2i     (di = 0)
    x_o = xb[:, W:]                                        # rows 2i + 1 (di = 1)

    # --- AdaptiveAvgPool2d(1) folded into the first 1x1-conv matmul ----------
    rs = (jnp.sum(x_e, axis=1, keepdims=True)
          + jnp.sum(x_o, axis=1, keepdims=True))           # (S, 1) per-row sums
    h = jnp.dot(w1g_ref[...], rs, precision=_HIGHEST,
                preferred_element_type=jnp.float32)        # (C8, 1)
    h = jnp.maximum(h + b1_ref[...], 0.0)
    z = jnp.dot(w2g_ref[...], h, precision=_HIGHEST,
                preferred_element_type=jnp.float32) + b2g_ref[...]
    attn = 1.0 / (1.0 + jnp.exp(-z))                       # (S, 1) == attn[c] per row

    # --- depthwise 2x2 stride-2 conv on (x * attn) ----------------------------
    me = me_ref[...]                                       # (1, W)
    mo = 1.0 - me
    se = attn * (wd00_ref[...] * me + wd01_ref[...] * mo)  # (S, W) scale for row 2i
    so = attn * (wd10_ref[...] * me + wd11_ref[...] * mo)  # (S, W) scale for row 2i+1
    q = x_e * se + x_o * so                                # (S, W) di-folded, dj-weighted
    # dj pair-sum + lane compaction W -> Wo on the (otherwise idle) MXU.
    o_ref[0] = (jnp.dot(q, sel_ref[...], precision=_HIGHEST,
                        preferred_element_type=jnp.float32)
                + bd_ref[...])


def _nfap_depthwise_kernel(x_ref, s00_ref, s01_ref, s10_ref, s11_ref, bd_ref,
                           me_ref, sel_ref, o_ref, *, W):
    """Two-pass fallback, pass 2: scale + 2x2 fold on a row tile.

    x_ref  : (1, tS, 2W)
    s??    : (1, tS, 1)   attn[b, c(s)] * wd[c(s), di, dj]
    bd     : (1, tS, 1)
    me     : (1, W)
    sel    : (W, Wo)
    o_ref  : (1, tS, Wo)
    """
    xb = x_ref[0]                                          # (tS, 2W)
    me = me_ref[...]
    mo = 1.0 - me
    se = s00_ref[0] * me + s01_ref[0] * mo                 # (tS, W)
    so = s10_ref[0] * me + s11_ref[0] * mo
    q = xb[:, :W] * se + xb[:, W:] * so                    # (tS, W)
    o_ref[0] = (jnp.dot(q, sel_ref[...], precision=_HIGHEST,
                        preferred_element_type=jnp.float32)
                + bd_ref[0])


# ----------------------------------------------------------------------------- wrapper


def _pick_row_tile(S, W, Wo, budget_bytes):
    """Largest multiple-of-8 divisor of S whose per-step VMEM footprint fits the budget.

    S is always a multiple of 8 (C % 8 == 0), so 8 is a guaranteed fallback — no
    "only candidate exceeds the budget" edge case.
    """
    Wop = ((Wo + 127) // 128) * 128
    per_row = 4 * (2 * (2 * W) + 2 * Wop + 5 * W + 16)     # in(x2) + out(x2) + temps + cols
    limit = max(8, budget_bytes // per_row)
    best = 8
    for t in range(8, S + 1, 8):
        if S % t == 0 and t <= limit:
            best = t
    return best


@functools.partial(jax.jit, static_argnames=("force_two_pass",))
def neighbor_feature_attention_pooling(x, params, *, force_two_pass=False):
    """x: (B, C, H, W) float32 NCHW (PyTorch contract). Returns NCHW (B, C, H//2, W//2)."""
    B, C, H, W = x.shape
    assert H % 2 == 0 and W % 2 == 0, "kernel=2, stride=2 assumes even H, W"
    assert C % 8 == 0, "in_channels must be divisible by 8 (C//8 attention width)"
    Ho, Wo = H // 2, W // 2
    C8 = C // 8
    S = C * Ho                                             # fused row index s = c*Ho + i

    # FREE views (pure metadata, no HBM traffic): this replaces the old im2col transpose.
    xr = x.reshape(B, S, 2 * W)                            # xr[b, c*Ho+i, di*W+w]

    # Parameter layouts (all tiny).
    w1 = params["w1"].reshape(C8, C)                       # 1x1 conv C -> C/8
    b1 = params["b1"].reshape(C8, 1)
    w2 = params["w2"].reshape(C, C8)                       # 1x1 conv C/8 -> C
    b2 = params["b2"].reshape(C)
    wd = params["wd"].reshape(C, 4)                        # taps k = di*2 + dj
    bd = params["bd"].reshape(C)

    me = (jnp.arange(W) % 2 == 0).astype(jnp.float32).reshape(1, W)
    sel = (jnp.arange(W)[:, None] // 2
           == jnp.arange(Wo)[None, :]).astype(jnp.float32)            # (W, Wo)
    bdg = jnp.repeat(bd, Ho).reshape(S, 1)

    cap = _vmem_capacity_bytes()
    Wop = ((Wo + 127) // 128) * 128

    # Fused-path VMEM estimate: double-buffered image + padded output blocks,
    # in-kernel temps (~2x the image), Ho-repeated MLP weights (double-buffered), slack.
    img_b = 4 * S * 2 * W
    out_b = 4 * S * Wop
    par_b = 4 * (2 * C8 * S + 7 * S + W + W * Wo + 2 * C8)
    fused_need = 2 * img_b + 2 * out_b + 2 * img_b + 2 * par_b + (2 << 20)
    use_fused = (not force_two_pass) and fused_need <= int(0.8 * cap)
    # TODO(synk): on v7x with B == 1 the fused grid=(B,) uses only one of the two
    # TensorCores; force_two_pass=True gives a (B, n_tiles) parallel grid instead.

    if use_fused:
        w1g = jnp.repeat(w1, Ho, axis=1) / float(H * W)    # (C8, S): pool fold
        w2g = jnp.repeat(w2, Ho, axis=0)                   # (S, C8)
        b2g = jnp.repeat(b2, Ho).reshape(S, 1)
        wdc = [jnp.repeat(wd[:, k], Ho).reshape(S, 1) for k in range(4)]

        vmem_limit = int(min(max(fused_need, 32 << 20), int(0.9 * cap)))
        cost = pl.CostEstimate(
            flops=int(B * (2 * S * W * Wo + 6 * S * W + 4 * C8 * S)),
            transcendentals=int(B * S),
            bytes_accessed=int(4 * B * (S * 2 * W + S * Wo) + par_b))

        const = lambda b: (0, 0)
        out = pl.pallas_call(
            functools.partial(_nfap_fused_kernel, W=W),
            out_shape=jax.ShapeDtypeStruct((B, S, Wo), jnp.float32),
            grid_spec=pltpu.PrefetchScalarGridSpec(
                num_scalar_prefetch=0,
                grid=(B,),
                in_specs=[
                    pl.BlockSpec((1, S, 2 * W), lambda b: (b, 0, 0)),
                    pl.BlockSpec((C8, S), const),
                    pl.BlockSpec((C8, 1), const),
                    pl.BlockSpec((S, C8), const),
                    pl.BlockSpec((S, 1), const),
                    pl.BlockSpec((S, 1), const),
                    pl.BlockSpec((S, 1), const),
                    pl.BlockSpec((S, 1), const),
                    pl.BlockSpec((S, 1), const),
                    pl.BlockSpec((S, 1), const),
                    pl.BlockSpec((1, W), const),
                    pl.BlockSpec((W, Wo), const),
                ],
                out_specs=pl.BlockSpec((1, S, Wo), lambda b: (b, 0, 0)),
            ),
            compiler_params=pltpu.CompilerParams(
                dimension_semantics=("parallel",),
                vmem_limit_bytes=vmem_limit),
            cost_estimate=cost,
        )(xr, w1g, b1, w2g, b2g, wdc[0], wdc[1], wdc[2], wdc[3], bdg, me, sel)
    else:
        # Pass 1 (XLA): pooled mean + tiny attention MLP for all batches (extra read of x
        # is unavoidable once the image no longer fits VMEM).  HIGHEST precision parity.
        pooled = jnp.mean(x, axis=(2, 3))                                    # (B, C)
        hh = jnp.maximum(jnp.dot(pooled, w1.T, precision=_HIGHEST)
                         + b1[:, 0][None, :], 0.0)                           # (B, C8)
        attn = 1.0 / (1.0 + jnp.exp(-(jnp.dot(hh, w2.T, precision=_HIGHEST)
                                      + b2[None, :])))                       # (B, C)

        # Per-row scale columns (tiny: ~8/W of the image in bytes).
        scols = [jnp.repeat(attn * wd[None, :, k], Ho, axis=1).reshape(B, S, 1)
                 for k in range(4)]
        bdg3 = bdg.reshape(1, S, 1)

        # Pass 2 (Pallas): scale + 2x2 fold, tiled over (B, row tiles), both parallel.
        budget = int(0.4 * cap)                            # generation-aware tile budget
        tS = _pick_row_tile(S, W, Wo, budget)
        n_t = S // tS

        step_b = 4 * (2 * tS * 2 * W + 2 * tS * Wop + 5 * tS * W
                      + 10 * tS + W + W * Wo)
        vmem_limit = int(min(max(step_b + (4 << 20), 32 << 20), int(0.9 * cap)))
        cost = pl.CostEstimate(
            flops=int(B * (2 * S * W * Wo + 6 * S * W)),
            transcendentals=0,
            bytes_accessed=int(4 * B * (S * 2 * W + S * Wo + 5 * S)))

        out = pl.pallas_call(
            functools.partial(_nfap_depthwise_kernel, W=W),
            out_shape=jax.ShapeDtypeStruct((B, S, Wo), jnp.float32),
            grid_spec=pltpu.PrefetchScalarGridSpec(
                num_scalar_prefetch=0,
                grid=(B, n_t),
                in_specs=[
                    pl.BlockSpec((1, tS, 2 * W), lambda b, t: (b, t, 0)),
                    pl.BlockSpec((1, tS, 1), lambda b, t: (b, t, 0)),
                    pl.BlockSpec((1, tS, 1), lambda b, t: (b, t, 0)),
                    pl.BlockSpec((1, tS, 1), lambda b, t: (b, t, 0)),
                    pl.BlockSpec((1, tS, 1), lambda b, t: (b, t, 0)),
                    pl.BlockSpec((1, tS, 1), lambda b, t: (0, t, 0)),
                    pl.BlockSpec((1, W), lambda b, t: (0, 0)),
                    pl.BlockSpec((W, Wo), lambda b, t: (0, 0)),
                ],
                out_specs=pl.BlockSpec((1, tS, Wo), lambda b, t: (b, t, 0)),
            ),
            compiler_params=pltpu.CompilerParams(
                dimension_semantics=("parallel", "parallel"),
                vmem_limit_bytes=vmem_limit),
            cost_estimate=cost,
        )(xr, scols[0], scols[1], scols[2], scols[3], bdg3, me, sel)

    # FREE view back to the NCHW contract (no transpose, no copy).
    return out.reshape(B, C, Ho, Wo)


# ----------------------------------------------------------------------------- reference


def _reference_forward(x, params):
    """Pure-JAX reference with exact PyTorch semantics (NCHW)."""
    C = x.shape[1]
    C8 = C // 8
    hp = jax.lax.Precision.HIGHEST
    pooled = jnp.mean(x, axis=(2, 3), keepdims=True)                     # (B,C,1,1)
    w1 = params["w1"].reshape(C8, C)
    w2 = params["w2"].reshape(C, C8)
    h = jnp.einsum("oc,bcxy->boxy", w1, pooled, precision=hp) + params["b1"][None, :, None, None]
    h = jnp.maximum(h, 0.0)
    a = jnp.einsum("oc,bcxy->boxy", w2, h, precision=hp) + params["b2"][None, :, None, None]
    a = jax.nn.sigmoid(a)
    xs = x * a
    wd = params["wd"]                                                     # (C,1,2,2)
    out = None
    for di in range(2):
        for dj in range(2):
            t = xs[:, :, di::2, dj::2] * wd[None, :, 0, di, dj][..., None, None]
            out = t if out is None else out + t
    return out + params["bd"][None, :, None, None]


def _make_params(key, C):
    C8 = C // 8
    ks = jax.random.split(key, 6)
    return {
        "w1": jax.random.normal(ks[0], (C8, C, 1, 1), jnp.float32) * 0.2,   # conv1x1 C->C/8
        "b1": jax.random.normal(ks[1], (C8,), jnp.float32) * 0.1,
        "w2": jax.random.normal(ks[2], (C, C8, 1, 1), jnp.float32) * 0.2,   # conv1x1 C/8->C
        "b2": jax.random.normal(ks[3], (C,), jnp.float32) * 0.1,
        "wd": jax.random.normal(ks[4], (C, 1, 2, 2), jnp.float32) * 0.3,    # depthwise 2x2
        "bd": jax.random.normal(ks[5], (C,), jnp.float32) * 0.1,
    }


if __name__ == "__main__":
    B, C, H, W = 2, 16, 16, 16
    key = jax.random.PRNGKey(0)
    kx, kp = jax.random.split(key)
    x = jax.random.normal(kx, (B, C, H, W), jnp.float32)
    params = _make_params(kp, C)

    ref = jax.block_until_ready(_reference_forward(x, params))

    # Fused single-pass path (default for images that fit VMEM).
    out = jax.block_until_ready(neighbor_feature_attention_pooling(x, params))
    assert out.shape == (B, C, H // 2, W // 2), out.shape
    assert jnp.allclose(out, ref, atol=1e-4, rtol=1e-4), float(jnp.max(jnp.abs(out - ref)))

    # Exercise the VMEM-bounded two-pass path (auto-selected for large images / v7x).
    out2 = jax.block_until_ready(
        neighbor_feature_attention_pooling(x, params, force_two_pass=True))
    assert jnp.allclose(out2, ref, atol=1e-4, rtol=1e-4), float(jnp.max(jnp.abs(out2 - ref)))

    print("KERNEL_OK")
</pallas_src>

<mosaic_0001>
module attributes {stable_mosaic.version = 11 : i64} {
  func.func @_nfap_fused_kernel(%arg0: i32, %arg1: memref<1x128x32xf32, #tpu.memory_space<vmem>>, %arg2: memref<2x128xf32, #tpu.memory_space<vmem>>, %arg3: memref<2x1xf32, #tpu.memory_space<vmem>>, %arg4: memref<128x2xf32, #tpu.memory_space<vmem>>, %arg5: memref<128x1xf32, #tpu.memory_space<vmem>>, %arg6: memref<128x1xf32, #tpu.memory_space<vmem>>, %arg7: memref<128x1xf32, #tpu.memory_space<vmem>>, %arg8: memref<128x1xf32, #tpu.memory_space<vmem>>, %arg9: memref<128x1xf32, #tpu.memory_space<vmem>>, %arg10: memref<128x1xf32, #tpu.memory_space<vmem>>, %arg11: memref<1x16xf32, #tpu.memory_space<vmem>>, %arg12: memref<16x8xf32, #tpu.memory_space<vmem>>, %arg13: memref<1x128x8xf32, #tpu.memory_space<vmem>>) attributes {dimension_semantics = [#tpu.dimension_semantics<parallel>], iteration_bounds = array<i64: 2>, scalar_prefetch = 0 : i64, scratch_operands = 0 : i64, tpu.core_type = #tpu.core_type<tc>, window_params = [{transform_indices = @transform_0, window_bounds = array<i64: 1, 128, 32>}, {pipeline_mode = #tpu.pipeline_mode<synchronous>, transform_indices = @transform_1, window_bounds = array<i64: 2, 128>}, {pipeline_mode = #tpu.pipeline_mode<synchronous>, transform_indices = @transform_2, window_bounds = array<i64: 2, 1>}, {pipeline_mode = #tpu.pipeline_mode<synchronous>, transform_indices = @transform_3, window_bounds = array<i64: 128, 2>}, {pipeline_mode = #tpu.pipeline_mode<synchronous>, transform_indices = @transform_4, window_bounds = array<i64: 128, 1>}, {pipeline_mode = #tpu.pipeline_mode<synchronous>, transform_indices = @transform_5, window_bounds = array<i64: 128, 1>}, {pipeline_mode = #tpu.pipeline_mode<synchronous>, transform_indices = @transform_6, window_bounds = array<i64: 128, 1>}, {pipeline_mode = #tpu.pipeline_mode<synchronous>, transform_indices = @transform_7, window_bounds = array<i64: 128, 1>}, {pipeline_mode = #tpu.pipeline_mode<synchronous>, transform_indices = @transform_8, window_bounds = array<i64: 128, 1>}, {pipeline_mode = #tpu.pipeline_mode<synchronous>, transform_indices = @transform_9, window_bounds = array<i64: 128, 1>}, {pipeline_mode = #tpu.pipeline_mode<synchronous>, transform_indices = @transform_10, window_bounds = array<i64: 1, 16>}, {pipeline_mode = #tpu.pipeline_mode<synchronous>, transform_indices = @transform_11, window_bounds = array<i64: 16, 8>}, {transform_indices = @transform_12, window_bounds = array<i64: 1, 128, 8>}]} {
    %c0 = arith.constant 0 : index
    %c0_0 = arith.constant 0 : index
    %c0_1 = arith.constant 0 : index
    %0 = vector.load %arg1[%c0, %c0_0, %c0_1] : memref<1x128x32xf32, #tpu.memory_space<vmem>>, vector<1x128x32xf32>
    %1 = vector.shape_cast %0 : vector<1x128x32xf32> to vector<128x32xf32>
    %2 = vector.extract_strided_slice %1 {offsets = [0, 0], sizes = [128, 16], strides = [1, 1]} : vector<128x32xf32> to vector<128x16xf32>
    %3 = vector.extract_strided_slice %1 {offsets = [0, 16], sizes = [128, 16], strides = [1, 1]} : vector<128x32xf32> to vector<128x16xf32>
    %cst = arith.constant dense<0.000000e+00> : vector<128xf32>
    %4 = vector.multi_reduction <add>, %2, %cst [1] : vector<128x16xf32> to vector<128xf32>
    %5 = vector.shape_cast %4 : vector<128xf32> to vector<128x1xf32>
    %cst_2 = arith.constant dense<0.000000e+00> : vector<128xf32>
    %6 = vector.multi_reduction <add>, %3, %cst_2 [1] : vector<128x16xf32> to vector<128xf32>
    %7 = vector.shape_cast %6 : vector<128xf32> to vector<128x1xf32>
    %8 = arith.addf %5, %7 : vector<128x1xf32>
    %c0_3 = arith.constant 0 : index
    %c0_4 = arith.constant 0 : index
    %9 = vector.load %arg2[%c0_3, %c0_4] : memref<2x128xf32, #tpu.memory_space<vmem>>, vector<2x128xf32>
    %cst_5 = arith.constant dense<0.000000e+00> : vector<2x1xf32>
    %10 = tpu.matmul %9, %8, %cst_5 {dimension_numbers = #tpu.dot_dimension_numbers<[1], [0], [0], [1], [0, 0, 1, 1], [], []>, precision = #tpu.contract_precision<fp32>} : vector<2x128xf32>, vector<128x1xf32>, vector<2x1xf32> -> vector<2x1xf32>
    %c0_6 = arith.constant 0 : index
    %c0_7 = arith.constant 0 : index
    %11 = vector.load %arg3[%c0_6, %c0_7] : memref<2x1xf32, #tpu.memory_space<vmem>>, vector<2x1xf32>
    %12 = arith.addf %10, %11 : vector<2x1xf32>
    %cst_8 = arith.constant 0.000000e+00 : f32
    %13 = vector.broadcast %cst_8 : f32 to vector<2x1xf32>
    %14 = arith.maximumf %12, %13 : vector<2x1xf32>
    %c0_9 = arith.constant 0 : index
    %c0_10 = arith.constant 0 : index
    %15 = vector.load %arg4[%c0_9, %c0_10] : memref<128x2xf32, #tpu.memory_space<vmem>>, vector<128x2xf32>
    %cst_11 = arith.constant dense<0.000000e+00> : vector<128x1xf32>
    %16 = tpu.matmul %15, %14, %cst_11 {dimension_numbers = #tpu.dot_dimension_numbers<[1], [0], [0], [1], [0, 0, 1, 1], [], []>, precision = #tpu.contract_precision<fp32>} : vector<128x2xf32>, vector<2x1xf32>, vector<128x1xf32> -> vector<128x1xf32>
    %c0_12 = arith.constant 0 : index
    %c0_13 = arith.constant 0 : index
    %17 = vector.load %arg5[%c0_12, %c0_13] : memref<128x1xf32, #tpu.memory_space<vmem>>, vector<128x1xf32>
    %18 = arith.addf %16, %17 : vector<128x1xf32>
    %cst_14 = arith.constant 0.000000e+00 : f32
    %19 = vector.broadcast %cst_14 : f32 to vector<128x1xf32>
    %20 = arith.subf %19, %18 : vector<128x1xf32>
    %21 = math.exp %20 : vector<128x1xf32>
    %cst_15 = arith.constant 1.000000e+00 : f32
    %22 = vector.broadcast %cst_15 : f32 to vector<128x1xf32>
    %23 = arith.addf %22, %21 : vector<128x1xf32>
    %cst_16 = arith.constant 1.000000e+00 : f32
    %24 = vector.broadcast %cst_16 : f32 to vector<128x1xf32>
    %25 = arith.divf %24, %23 : vector<128x1xf32>
    %c0_17 = arith.constant 0 : index
    %c0_18 = arith.constant 0 : index
    %26 = vector.load %arg11[%c0_17, %c0_18] : memref<1x16xf32, #tpu.memory_space<vmem>>, vector<1x16xf32>
    %cst_19 = arith.constant 1.000000e+00 : f32
    %27 = vector.broadcast %cst_19 : f32 to vector<1x16xf32>
    %28 = arith.subf %27, %26 : vector<1x16xf32>
    %c0_20 = arith.constant 0 : index
    %c0_21 = arith.constant 0 : index
    %29 = vector.load %arg6[%c0_20, %c0_21] : memref<128x1xf32, #tpu.memory_space<vmem>>, vector<128x1xf32>
    %30 = vector.broadcast %29 : vector<128x1xf32> to vector<128x16xf32>
    %31 = vector.broadcast %26 : vector<1x16xf32> to vector<128x16xf32>
    %32 = arith.mulf %30, %31 : vector<128x16xf32>
    %c0_22 = arith.constant 0 : index
    %c0_23 = arith.constant 0 : index
    %33 = vector.load %arg7[%c0_22, %c0_23] : memref<128x1xf32, #tpu.memory_space<vmem>>, vector<128x1xf32>
    %34 = vector.broadcast %33 : vector<128x1xf32> to vector<128x16xf32>
    %35 = vector.broadcast %28 : vector<1x16xf32> to vector<128x16xf32>
    %36 = arith.mulf %34, %35 : vector<128x16xf32>
    %37 = arith.addf %32, %36 : vector<128x16xf32>
    %38 = vector.broadcast %25 : vector<128x1xf32> to vector<128x16xf32>
    %39 = arith.mulf %38, %37 : vector<128x16xf32>
    %c0_24 = arith.constant 0 : index
    %c0_25 = arith.constant 0 : index
    %40 = vector.load %arg8[%c0_24, %c0_25] : memref<128x1xf32, #tpu.memory_space<vmem>>, vector<128x1xf32>
    %41 = vector.broadcast %40 : vector<128x1xf32> to vector<128x16xf32>
    %42 = vector.broadcast %26 : vector<1x16xf32> to vector<128x16xf32>
    %43 = arith.mulf %41, %42 : vector<128x16xf32>
    %c0_26 = arith.constant 0 : index
    %c0_27 = arith.constant 0 : index
    %44 = vector.load %arg9[%c0_26, %c0_27] : memref<128x1xf32, #tpu.memory_space<vmem>>, vector<128x1xf32>
    %45 = vector.broadcast %44 : vector<128x1xf32> to vector<128x16xf32>
    %46 = vector.broadcast %28 : vector<1x16xf32> to vector<128x16xf32>
    %47 = arith.mulf %45, %46 : vector<128x16xf32>
    %48 = arith.addf %43, %47 : vector<128x16xf32>
    %49 = vector.broadcast %25 : vector<128x1xf32> to vector<128x16xf32>
    %50 = arith.mulf %49, %48 : vector<128x16xf32>
    %51 = arith.mulf %2, %39 : vector<128x16xf32>
    %52 = arith.mulf %3, %50 : vector<128x16xf32>
    %53 = arith.addf %51, %52 : vector<128x16xf32>
    %c0_28 = arith.constant 0 : index
    %c0_29 = arith.constant 0 : index
    %54 = vector.load %arg12[%c0_28, %c0_29] : memref<16x8xf32, #tpu.memory_space<vmem>>, vector<16x8xf32>
    %cst_30 = arith.constant dense<0.000000e+00> : vector<128x8xf32>
    %55 = tpu.matmul %53, %54, %cst_30 {dimension_numbers = #tpu.dot_dimension_numbers<[1], [0], [0], [1], [0, 0, 1, 1], [], []>, precision = #tpu.contract_precision<fp32>} : vector<128x16xf32>, vector<16x8xf32>, vector<128x8xf32> -> vector<128x8xf32>
    %c0_31 = arith.constant 0 : index
    %c0_32 = arith.constant 0 : index
    %56 = vector.load %arg10[%c0_31, %c0_32] : memref<128x1xf32, #tpu.memory_space<vmem>>, vector<128x1xf32>
    %57 = vector.broadcast %56 : vector<128x1xf32> to vector<128x8xf32>
    %58 = arith.addf %55, %57 : vector<128x8xf32>
    %c0_33 = arith.constant 0 : index
    %c0_34 = arith.constant 0 : index
    %c0_35 = arith.constant 0 : index
    %59 = vector.load %arg13[%c0_33, %c0_34, %c0_35] : memref<1x128x8xf32, #tpu.memory_space<vmem>>, vector<1x128x8xf32>
    %60 = vector.shape_cast %59 : vector<1x128x8xf32> to vector<128x8xf32>
    %61 = vector.shape_cast %58 : vector<128x8xf32> to vector<1x128x8xf32>
    tpu.vector_store %arg13[%c0_33, %c0_34, %c0_35], %61 {strides = array<i32>} : memref<1x128x8xf32, #tpu.memory_space<vmem>>, vector<1x128x8xf32>,
    return
  }
  func.func @transform_0(%arg0: i32) -> (i32, i32, i32) {
    %c0_i32 = arith.constant 0 : i32
    %c0_i32_0 = arith.constant 0 : i32
    %c0_i32_1 = arith.constant 0 : i32
    return %arg0, %c0_i32, %c0_i32_0 : i32, i32, i32
  }
  func.func @transform_1(%arg0: i32) -> (i32, i32) {
    %c0_i32 = arith.constant 0 : i32
    %c0_i32_0 = arith.constant 0 : i32
    %c0_i32_1 = arith.constant 0 : i32
    return %c0_i32, %c0_i32_0 : i32, i32
  }
  func.func @transform_2(%arg0: i32) -> (i32, i32) {
    %c0_i32 = arith.constant 0 : i32
    %c0_i32_0 = arith.constant 0 : i32
    %c0_i32_1 = arith.constant 0 : i32
    return %c0_i32, %c0_i32_0 : i32, i32
  }
  func.func @transform_3(%arg0: i32) -> (i32, i32) {
    %c0_i32 = arith.constant 0 : i32
    %c0_i32_0 = arith.constant 0 : i32
    %c0_i32_1 = arith.constant 0 : i32
    return %c0_i32, %c0_i32_0 : i32, i32
  }
  func.func @transform_4(%arg0: i32) -> (i32, i32) {
    %c0_i32 = arith.constant 0 : i32
    %c0_i32_0 = arith.constant 0 : i32
    %c0_i32_1 = arith.constant 0 : i32
    return %c0_i32, %c0_i32_0 : i32, i32
  }
  func.func @transform_5(%arg0: i32) -> (i32, i32) {
    %c0_i32 = arith.constant 0 : i32
    %c0_i32_0 = arith.constant 0 : i32
    %c0_i32_1 = arith.constant 0 : i32
    return %c0_i32, %c0_i32_0 : i32, i32
  }
  func.func @transform_6(%arg0: i32) -> (i32, i32) {
    %c0_i32 = arith.constant 0 : i32
    %c0_i32_0 = arith.constant 0 : i32
    %c0_i32_1 = arith.constant 0 : i32
    return %c0_i32, %c0_i32_0 : i32, i32
  }
  func.func @transform_7(%arg0: i32) -> (i32, i32) {
    %c0_i32 = arith.constant 0 : i32
    %c0_i32_0 = arith.constant 0 : i32
    %c0_i32_1 = arith.constant 0 : i32
    return %c0_i32, %c0_i32_0 : i32, i32
  }
  func.func @transform_8(%arg0: i32) -> (i32, i32) {
    %c0_i32 = arith.constant 0 : i32
    %c0_i32_0 = arith.constant 0 : i32
    %c0_i32_1 = arith.constant 0 : i32
    return %c0_i32, %c0_i32_0 : i32, i32
  }
  func.func @transform_9(%arg0: i32) -> (i32, i32) {
    %c0_i32 = arith.constant 0 : i32
    %c0_i32_0 = arith.constant 0 : i32
    %c0_i32_1 = arith.constant 0 : i32
    return %c0_i32, %c0_i32_0 : i32, i32
  }
  func.func @transform_10(%arg0: i32) -> (i32, i32) {
    %c0_i32 = arith.constant 0 : i32
    %c0_i32_0 = arith.constant 0 : i32
    %c0_i32_1 = arith.constant 0 : i32
    return %c0_i32, %c0_i32_0 : i32, i32
  }
  func.func @transform_11(%arg0: i32) -> (i32, i32) {
    %c0_i32 = arith.constant 0 : i32
    %c0_i32_0 = arith.constant 0 : i32
    %c0_i32_1 = arith.constant 0 : i32
    return %c0_i32, %c0_i32_0 : i32, i32
  }
  func.func @transform_12(%arg0: i32) -> (i32, i32, i32) {
    %c0_i32 = arith.constant 0 : i32
    %c0_i32_0 = arith.constant 0 : i32
    %c0_i32_1 = arith.constant 0 : i32
    return %arg0, %c0_i32, %c0_i32_0 : i32, i32, i32
  }
}

</mosaic_0001>

<bundles_post_ra>
// kernel: neighbor_feature_attention_pooling.1
= control target key start
LH: loop header
LB: loop body
LE: loop exit
PB: predicated region body
PF: predicated region fallthrough
CT: control target
= control target key end

     0   :  { %s6032_s21 = smov 0   ;;  %s7636_s0 = inlined_call_operand.vmem [shape: f32[2,128,32], index: 0, kind: input, shape index: {}]   ;;  %s7637_s1 = inlined_call_operand.vmem [shape: f32[2,128], index: 1, kind: input, shape index: {}]   ;;  %s7638_s2 = inlined_call_operand.vmem [shape: f32[2,1], index: 2, kind: input, shape index: {}]   ;;  %s7639_s3 = inlined_call_operand.vmem [shape: f32[128,2], index: 3, kind: input, shape index: {}]   ;;  %s7640_s4 = inlined_call_operand.vmem [shape: f32[128,1], index: 4, kind: input, shape index: {}]   ;;  %s7641_s5 = inlined_call_operand.vmem [shape: f32[128,1], index: 5, kind: input, shape index: {}]   ;;  %s7642_s6 = inlined_call_operand.vmem [shape: f32[128,1], index: 6, kind: input, shape index: {}]   ;;  %s7643_s7 = inlined_call_operand.vmem [shape: f32[128,1], index: 7, kind: input, shape index: {}]   ;;  %s7644_s8 = inlined_call_operand.vmem [shape: f32[128,1], index: 8, kind: input, shape index: {}]   ;;  %s7645_s9 = inlined_call_operand.vmem [shape: f32[128,1], index: 9, kind: input, shape index: {}]   ;;  %s7646_s10 = inlined_call_operand.vmem [shape: f32[1,16], index: 10, kind: input, shape index: {}]   ;;  %s7647_s11 = inlined_call_operand.vmem [shape: f32[16,8], index: 11, kind: input, shape index: {}]   ;;  %s7648_s12 = inlined_call_operand.vmem [shape: f32[2,128,8], index: 12, kind: output, shape index: {}]  }
   0x1 LB: > { %s4627_s22 = sadd.s32 4294967295, %s5959_s21   ;;  %p4631_p0 = scmp.ge.s32.totalorder %s5959_s21, 1  ;;  %s5959_s21 = sphi %s6032_s21, %s22_s21  }
   0x2   : > { %p362_p1 = scmp.lt.s32.totalorder %s5959_s21, 3 }
   0x4   : > { %p363_p2 = pnand %p4631_p0, %p362_p1 }
   0x5   : > { %p404_p3 = scmp.lt.s32.totalorder (!%p363_p2), %s4627_s22, 1  ;;  %s5961_s27 = smov (!%p363_p2), 112   ;;  %vm430_vm0 = vcmask (!%p363_p2), 130048   ;;  %v5962_v60 = vmov (!%p363_p2), 0.0|0.0   ;;  %vm5963_vm1 = vmmov (!%p363_p2), 0   ;;  %vm1283_vm2 = vcmask (!%p363_p2), 15360  }
   0x6   : > { %366 = sbr.rel (%p363_p2) target bundleno = 1789 (0x6fd), region = 68  ;;  %5486 = vmatprep.subr.bf16.mxu0 (!%p363_p2), %v5962_v60  ;;  %vm1332_vm3 = vcmask (!%p363_p2), 1041408   ;;  %s5966_s29 = smov (!%p363_p2), 16   ;;  %vm4555_vm4 = vcmask (!%p363_p2), 64512  }
   0xd   : > { %s7654_s22 = smov (!%p404_p3, %s4627_s22), 1 }
   0xe   : > { %s4638_s23 = sshll.u32 %s7654_s22, 7 }
   0xf   : > { %s6048_s26 = scalar_lea.vmem %s7636_s0, %s4638_s23  ;;  %s7599_s25 = scalar_lea.vmem %s7648_s12, %s4638_s23 }
  0x10   : > { %v416_v0 = vld [vmem:[%s6048_s26 + $0x10] sm:$0xff]  ;;  %v414_v1 = vld [vmem:[%s6048_s26] sm:$0xff]  ;;  %v415_v2 = vld [vmem:[%s6048_s26 + $0x8] sm:$0xff] }
  0x11   : > { %499 = vrot.lane.b32.xlu1 %v416_v0, %s5961_s27  ;;  %495 = vrot.lane.b32.xlu0 %v414_v1, %s5961_s27  ;;  %v417_v3 = vld [vmem:[%s6048_s26 + $0x18] sm:$0xff]  ;;  %v418_v4 = vld [vmem:[%s6048_s26 + $0x20] sm:$0xff]  ;;  %v431_v16 = vsel %vm430_vm0, %v414_v1, 0.0  ;;  %v434_v18 = vsel %vm430_vm0, %v415_v2, 0.0  ;;  %v437_v20 = vsel %vm430_vm0, %v416_v0, 0.0  ;;  %v5964_v1 = vmov 0.0  }
  0x12   : > { %v419_v5 = vld [vmem:[%s6048_s26 + $0x28] sm:$0xff]  ;;  %v420_v6 = vld [vmem:[%s6048_s26 + $0x30] sm:$0xff]  ;;  %v421_v7 = vld [vmem:[%s6048_s26 + $0x38] sm:$0xff]  ;;  %v440_v17 = vsel %vm430_vm0, %v417_v3, 0.0  ;;  %v443_v22 = vsel %vm430_vm0, %v418_v4, 0.0  ;;  %4984 = vmatprep.mubr.msk.f32.mxu0 %vm5963_vm1, %v5964_v1 }
  0x13   : > { %v422_v8 = vld [vmem:[%s6048_s26 + $0x40] sm:$0xff]  ;;  %v423_v9 = vld [vmem:[%s6048_s26 + $0x48] sm:$0xff]  ;;  %v424_v10 = vld [vmem:[%s6048_s26 + $0x50] sm:$0xff]  ;;  %v446_v19 = vsel %vm430_vm0, %v419_v5, 0.0  ;;  %v452_v21 = vsel %vm430_vm0, %v421_v7, 0.0  ;;  %v449_v24 = vsel %vm430_vm0, %v420_v6, 0.0 }
  0x14   : > { %v425_v11 = vld [vmem:[%s6048_s26 + $0x58] sm:$0xff]  ;;  %v426_v12 = vld [vmem:[%s6048_s26 + $0x60] sm:$0xff]  ;;  %v427_v13 = vld [vmem:[%s6048_s26 + $0x68] sm:$0xff]  ;;  %v458_v23 = vsel %vm430_vm0, %v423_v9, 0.0  ;;  %v455_v26 = vsel %vm430_vm0, %v422_v8, 0.0  ;;  %v461_v28 = vsel %vm430_vm0, %v424_v10, 0.0 }
  0x15   : > { %497 = vrot.lane.b32.xlu0 %v415_v2, %s5961_s27  ;;  %501 = vrot.lane.b32.xlu1 %v417_v3, %s5961_s27  ;;  %v428_v14 = vld [vmem:[%s6048_s26 + $0x70] sm:$0xff]  ;;  %v429_v15 = vld [vmem:[%s6048_s26 + $0x78] sm:$0xff]  ;;  %v464_v25 = vsel %vm430_vm0, %v425_v11, 0.0  ;;  %v470_v27 = vsel %vm430_vm0, %v427_v13, 0.0  ;;  %v467_v30 = vsel %vm430_vm0, %v426_v12, 0.0 }
  0x16   : > { %v476_v29 = vsel %vm430_vm0, %v429_v15, 0.0  ;;  %v473_v31 = vsel %vm430_vm0, %v428_v14, 0.0 }
  0x19   : > { %503 = vrot.lane.b32.xlu0 %v418_v4, %s5961_s27  ;;  %505 = vrot.lane.b32.xlu1 %v419_v5, %s5961_s27 }
  0x1d   : > { %507 = vrot.lane.b32.xlu0 %v420_v6, %s5961_s27  ;;  %509 = vrot.lane.b32.xlu1 %v421_v7, %s5961_s27 }
  0x21   : > { %511 = vrot.lane.b32.xlu0 %v422_v8, %s5961_s27  ;;  %513 = vrot.lane.b32.xlu1 %v423_v9, %s5961_s27 }
  0x25   : > { %515 = vrot.lane.b32.xlu0 %v424_v10, %s5961_s27  ;;  %517 = vrot.lane.b32.xlu1 %v425_v11, %s5961_s27 }
  0x29   : > { %519 = vrot.lane.b32.xlu0 %v426_v12, %s5961_s27  ;;  %521 = vrot.lane.b32.xlu1 %v427_v13, %s5961_s27 }
  0x2d   : > { %523 = vrot.lane.b32.xlu0 %v428_v14, %s5961_s27  ;;  %525 = vrot.lane.b32.xlu1 %v429_v15, %s5961_s27 }
  0x4c   : > { %432 = vadd.xlane.f32.xlu0 %v431_v16 }
  0x50   : > { %441 = vadd.xlane.f32.xlu0 %v440_v17 }
  0x51   : > { %435 = vadd.xlane.f32.xlu1 %v434_v18 }
  0x54   : > { %447 = vadd.xlane.f32.xlu0 %v446_v19 }
  0x55   : > { %438 = vadd.xlane.f32.xlu1 %v437_v20 }
  0x58   : > { %453 = vadd.xlane.f32.xlu0 %v452_v21 }
  0x59   : > { %444 = vadd.xlane.f32.xlu1 %v443_v22 }
  0x5c   : > { %459 = vadd.xlane.f32.xlu0 %v458_v23 }
  0x5d   : > { %450 = vadd.xlane.f32.xlu1 %v449_v24 }
  0x60   : > { %465 = vadd.xlane.f32.xlu0 %v464_v25 }
  0x61   : > { %456 = vadd.xlane.f32.xlu1 %v455_v26 }
  0x64   : > { %471 = vadd.xlane.f32.xlu0 %v470_v27 }
  0x65   : > { %462 = vadd.xlane.f32.xlu1 %v461_v28 }
  0x68   : > { %477 = vadd.xlane.f32.xlu0 %v476_v29 }
  0x69   : > { %468 = vadd.xlane.f32.xlu1 %v467_v30 }
  0x6d   : > { %474 = vadd.xlane.f32.xlu1 %v473_v31 }
  0x83   : > { %v500_v32 = vpop.permute.xlu1 %499  ;;  %v496_v33 = vpop.permute.xlu0 %495 }
  0x84   : > { %v549_v34 = vsel %vm430_vm0, %v500_v32, 0.0  ;;  %v543_v35 = vsel %vm430_vm0, %v496_v33, 0.0 }
  0x85   : > { %550 = vadd.xlane.f32.xlu1 %v549_v34  ;;  %544 = vadd.xlane.f32.xlu0 %v543_v35 }
  0x87   : > { %v498_v36 = vpop.permute.xlu0 %497  ;;  %v502_v37 = vpop.permute.xlu1 %501 }
  0x88   : > { %v546_v38 = vsel %vm430_vm0, %v498_v36, 0.0  ;;  %v552_v39 = vsel %vm430_vm0, %v502_v37, 0.0 }
  0x89   : > { %547 = vadd.xlane.f32.xlu0 %v546_v38 }
  0x8b   : > { %v504_v40 = vpop.permute.xlu0 %503  ;;  %v506_v41 = vpop.permute.xlu1 %505 }
  0x8c   : > { %v555_v42 = vsel %vm430_vm0, %v504_v40, 0.0  ;;  %v558_v43 = vsel %vm430_vm0, %v506_v41, 0.0 }
  0x8d   : > { %556 = vadd.xlane.f32.xlu1 %v555_v42  ;;  %553 = vadd.xlane.f32.xlu0 %v552_v39 }
  0x8f   : > { %v508_v44 = vpop.permute.xlu0 %507  ;;  %v510_v45 = vpop.permute.xlu1 %509 }
  0x90   : > { %v561_v46 = vsel %vm430_vm0, %v508_v44, 0.0  ;;  %v564_v47 = vsel %vm430_vm0, %v510_v45, 0.0 }
  0x91   : > { %562 = vadd.xlane.f32.xlu1 %v561_v46  ;;  %559 = vadd.xlane.f32.xlu0 %v558_v43 }
  0x93   : > { %v512_v48 = vpop.permute.xlu0 %511  ;;  %v514_v49 = vpop.permute.xlu1 %513 }
  0x94   : > { %v567_v50 = vsel %vm430_vm0, %v512_v48, 0.0  ;;  %v570_v51 = vsel %vm430_vm0, %v514_v49, 0.0 }
  0x95   : > { %568 = vadd.xlane.f32.xlu1 %v567_v50  ;;  %565 = vadd.xlane.f32.xlu0 %v564_v47 }
  0x97   : > { %v516_v52 = vpop.permute.xlu0 %515  ;;  %v518_v53 = vpop.permute.xlu1 %517 }
  0x98   : > { %v573_v54 = vsel %vm430_vm0, %v516_v52, 0.0  ;;  %v576_v55 = vsel %vm430_vm0, %v518_v53, 0.0 }
  0x99   : > { %574 = vadd.xlane.f32.xlu1 %v573_v54  ;;  %571 = vadd.xlane.f32.xlu0 %v570_v51 }
  0x9b   : > { %v520_v56 = vpop.permute.xlu0 %519  ;;  %v522_v57 = vpop.permute.xlu1 %521 }
  0x9c   : > { %v579_v58 = vsel %vm430_vm0, %v520_v56, 0.0  ;;  %v582_v59 = vsel %vm430_vm0, %v522_v57, 0.0 }
  0x9d   : > { %580 = vadd.xlane.f32.xlu1 %v579_v58  ;;  %577 = vadd.xlane.f32.xlu0 %v576_v55 }
  0x9f   : > { %v524_v61 = vpop.permute.xlu0 %523  ;;  %v526_v62 = vpop.permute.xlu1 %525 }
  0xa0   : > { %v585_v63 = vsel %vm430_vm0, %v524_v61, 0.0  ;;  %v588_v0 = vsel %vm430_vm0, %v526_v62, 0.0  ;;  %v607_v62 = vld [vmem:[%s7637_s1] sm:$0x3] }
  0xa1   : > { %586 = vadd.xlane.f32.xlu1 %v585_v63  ;;  %583 = vadd.xlane.f32.xlu0 %v582_v59 }
  0xa5   : > { %589 = vadd.xlane.f32.xlu0 %v588_v0 }
  0xd9   : > { %v433_v2 = vpop.xlane.xlu0 %432 }
  0xdd   : > { %v442_v4 = vpop.xlane.xlu0 %441 }
  0xde   : > { %v436_v3 = vpop.xlane.xlu1 %435 }
  0xe1   : > { %v448_v6 = vpop.xlane.xlu0 %447 }
  0xe2   : > { %v439_v5 = vpop.xlane.xlu1 %438 }
  0xe5   : > { %v454_v8 = vpop.xlane.xlu0 %453 }
  0xe6   : > { %v445_v7 = vpop.xlane.xlu1 %444 }
  0xe9   : > { %v6117_v10 = vpop.xlane.xlu0 %459 }
  0xea   : > { %v451_v9 = vpop.xlane.xlu1 %450 }
  0xed   : > { %v6119_v12 = vpop.xlane.xlu0 %465 }
  0xee   : > { %v457_v11 = vpop.xlane.xlu1 %456 }
  0xf1   : > { %v6121_v14 = vpop.xlane.xlu0 %471 }
  0xf2   : > { %v463_v13 = vpop.xlane.xlu1 %462 }
  0xf5   : > { %v6125_v16 = vpop.xlane.xlu0 %477 }
  0xf6   : > { %v6123_v15 = vpop.xlane.xlu1 %468 }
  0xfa   : > { %v6127_v17 = vpop.xlane.xlu1 %474 }
 0x112   : > { %v545_v18 = vpop.xlane.xlu0 %544  ;;  %v551_v20 = vpop.xlane.xlu1 %550 }
 0x113   : > { %v591_v19 = vadd.f32 %v545_v18, %v433_v2  ;;  %v593_v24 = vadd.f32 %v551_v20, %v439_v5 }
 0x115   : > { %v610_v21 = vand.u32 4294901760, %v591_v19  ;;  %v616_v31 = vand.u32 4294901760, %v593_v24 }
 0x116   : > { %v548_v22 = vpop.xlane.xlu0 %547 }
 0x117   : > { %v592_v23 = vadd.f32 %v548_v22, %v436_v3  ;;  %v6129_v26 = vsub.f32 %v591_v19, %v610_v21  ;;  %v6139_v42 = vsub.f32 %v593_v24, %v616_v31 }
 0x119   : > { %v613_v25 = vand.u32 4294901760, %v592_v23  ;;  %v703_v35 = vand.u32 4294901760, %v6129_v26  ;;  %v717_v53 = vand.u32 4294901760, %v6139_v42 }
 0x11a   : > { %v557_v27 = vpop.xlane.xlu1 %556  ;;  %v554_v28 = vpop.xlane.xlu0 %553 }
 0x11b   : > { %v6131_v29 = vsub.f32 %v592_v23, %v613_v25  ;;  %v595_v30 = vadd.f32 %v557_v27, %v445_v7  ;;  %v594_v32 = vadd.f32 %v554_v28, %v442_v4  ;;  %v6133_v33 = vpack.c.bf16 %v613_v25, %v610_v21 }
 0x11d   : > { %v710_v34 = vand.u32 4294901760, %v6131_v29  ;;  %v619_v36 = vand.u32 4294901760, %v594_v32  ;;  %5488 = vmatpush3.bf16.msra.mxu0 %v6133_v33  ;;  %v622_v39 = vand.u32 4294901760, %v595_v30 }
 0x11e   : > { %v563_v37 = vpop.xlane.xlu1 %562  ;;  %v560_v38 = vpop.xlane.xlu0 %559  ;;  %5489 = vmatprep.subr.bf16.mxu0 %v5962_v60 }
 0x11f   : > { %v597_v40 = vadd.f32 %v563_v37, %v451_v9  ;;  %v596_v41 = vadd.f32 %v560_v38, %v448_v6  ;;  %v6141_v43 = vsub.f32 %v594_v32, %v619_v36  ;;  %v6143_v44 = vpack.c.bf16 %v619_v36, %v616_v31 }
 0x120   : > { %v6149_v45 = vpack.c.bf16 %v710_v34, %v703_v35  ;;  %v6153_v50 = vsub.f32 %v595_v30, %v622_v39 }
 0x121   : > { %v625_v46 = vand.u32 4294901760, %v596_v41  ;;  %v724_v47 = vand.u32 4294901760, %v6141_v43  ;;  %5491 = vmatpush3.bf16.msra.mxu0 %v6143_v44  ;;  %v628_v51 = vand.u32 4294901760, %v597_v40 }
 0x122   : > { %v569_v48 = vpop.xlane.xlu1 %568  ;;  %v566_v49 = vpop.xlane.xlu0 %565  ;;  %5492 = vmatprep.subr.bf16.mxu0 %v5962_v60  ;;  %v731_v0 = vand.u32 4294901760, %v6153_v50 }
 0x123   : > { %v6155_v52 = vsub.f32 %v596_v41, %v625_v46  ;;  %v599_v54 = vadd.f32 %v569_v48, %v457_v11  ;;  %v598_v55 = vadd.f32 %v566_v49, %v454_v8  ;;  %v6159_v56 = vpack.c.bf16 %v625_v46, %v622_v39 }
 0x124   : > { %v6170_v63 = vpack.c.bf16 %v724_v47, %v717_v53  ;;  %v6173_v2 = vsub.f32 %v597_v40, %v628_v51  ;;  %v6181_v8 = vand.u32 4294901760, %v607_v62 }
 0x125   : > { %v738_v57 = vand.u32 4294901760, %v6155_v52  ;;  %v631_v58 = vand.u32 4294901760, %v598_v55  ;;  %5494 = vmatpush3.bf16.msra.mxu0 %v6159_v56  ;;  %v634_v4 = vand.u32 4294901760, %v599_v54 }
 0x126   : > { %v575_v59 = vpop.xlane.xlu1 %574  ;;  %v572_v61 = vpop.xlane.xlu0 %571  ;;  %5495 = vmatprep.subr.bf16.mxu0 %v5962_v60  ;;  %v745_v22 = vand.u32 4294901760, %v6173_v2  ;;  %v6202_v28 = vsub.f32 %v607_v62, %v6181_v8 }
 0x127   : > { %v601_v3 = vadd.f32 %v575_v59, %v463_v13  ;;  %v6176_v5 = vsub.f32 %v598_v55, %v631_v58  ;;  %v600_v6 = vadd.f32 %v572_v61, %v6117_v10  ;;  %v6179_v7 = vpack.c.bf16 %v631_v58, %v628_v51 }
 0x128   : > { %v6189_v13 = vpack.c.bf16 %v738_v57, %v731_v0  ;;  %v6195_v23 = vsub.f32 %v599_v54, %v634_v4  ;;  %v692_v49 = vand.u32 4294901760, %v6202_v28  ;;  %v711_v59 = vsub.f32 %v6131_v29, %v710_v34 }
 0x129   : > { %v752_v9 = vand.u32 4294901760, %v6176_v5  ;;  %v640_v11 = vand.u32 4294901760, %v601_v3  ;;  %v637_v18 = vand.u32 4294901760, %v600_v6  ;;  %5497 = vmatpush3.bf16.msra.mxu0 %v6179_v7 }
 0x12a   : > { %v581_v19 = vpop.xlane.xlu1 %580  ;;  %v578_v20 = vpop.xlane.xlu0 %577  ;;  %5498 = vmatprep.subr.bf16.mxu0 %v5962_v60  ;;  %v759_v39 = vand.u32 4294901760, %v6195_v23 }
 0x12b   : > { %v603_v10 = vadd.f32 %v581_v19, %v6123_v15  ;;  %v602_v21 = vadd.f32 %v578_v20, %v6119_v12  ;;  %v6197_v24 = vsub.f32 %v600_v6, %v637_v18  ;;  %v6199_v25 = vpack.c.bf16 %v637_v18, %v634_v4 }
 0x12c   : > { %v6204_v30 = vsub.f32 %v601_v3, %v640_v11  ;;  %v6212_v36 = vpack.c.bf16 %v752_v9, %v745_v22 }
 0x12d   : > { %v643_v27 = vand.u32 4294901760, %v602_v21  ;;  %v766_v15 = vand.u32 4294901760, %v6197_v24  ;;  %v646_v31 = vand.u32 4294901760, %v603_v10  ;;  %5500 = vmatpush3.bf16.msra.mxu0 %v6199_v25 }
 0x12e   : > { %v587_v12 = vpop.xlane.xlu1 %586  ;;  %v584_v32 = vpop.xlane.xlu0 %583  ;;  %5501 = vmatprep.subr.bf16.mxu0 %v5962_v60  ;;  %v773_v51 = vand.u32 4294901760, %v6204_v30 }
 0x12f   : > { %v6214_v37 = vsub.f32 %v602_v21, %v643_v27  ;;  %v605_v38 = vadd.f32 %v587_v12, %v6127_v17  ;;  %v604_v40 = vadd.f32 %v584_v32, %v6121_v14  ;;  %v6220_v41 = vpack.c.bf16 %v643_v27, %v640_v11 }
 0x130   : > { %v6225_v54 = vsub.f32 %v603_v10, %v646_v31  ;;  %v6230_v58 = vpack.c.bf16 %v766_v15, %v759_v39  ;;  %v693_v11 = vsub.f32 %v6202_v28, %v692_v49  ;;  %v712_v10 = vand.u32 4294901760, %v711_v59 }
 0x131   : > { %v780_v46 = vand.u32 4294901760, %v6214_v37  ;;  %v652_v48 = vand.u32 4294901760, %v605_v38  ;;  %v649_v55 = vand.u32 4294901760, %v604_v40  ;;  %5503 = vmatpush3.bf16.msra.mxu0 %v6220_v41  ;;  %v725_v21 = vsub.f32 %v6141_v43, %v724_v47 }
 0x132   : > { %v590_v17 = vpop.xlane.xlu0 %589  ;;  %5504 = vmatprep.subr.bf16.mxu0 %v5962_v60  ;;  %v787_v18 = vand.u32 4294901760, %v6225_v54  ;;  %v694_v12 = vand.u32 4294901760, %v693_v11  ;;  %v718_v32 = vsub.f32 %v6139_v42, %v717_v53  ;;  %v739_v47 = vsub.f32 %v6155_v52, %v738_v57 }
 0x133   : > { %v606_v14 = vadd.f32 %v590_v17, %v6125_v16  ;;  %v6237_v61 = vsub.f32 %v604_v40, %v649_v55  ;;  %v6239_v62 = vpack.c.bf16 %v649_v55, %v646_v31  ;;  %v6241_v3 = vpack.c.bf16 %v780_v46, %v773_v51 }
 0x134   : > { %v6243_v4 = vsub.f32 %v605_v38, %v652_v48  ;;  %v704_v16 = vsub.f32 %v6129_v26, %v703_v35  ;;  %v719_v17 = vand.u32 4294901760, %v718_v32  ;;  %v740_v53 = vand.u32 4294901760, %v739_v47 }
 0x135   : > { %v655_v6 = vand.u32 4294901760, %v606_v14  ;;  %v794_v34 = vand.u32 4294901760, %v6237_v61  ;;  %5506 = vmatpush3.bf16.msra.mxu0 %v6239_v62  ;;  %v753_v59 = vsub.f32 %v6176_v5, %v752_v9  ;;  %v746_v11 = vsub.f32 %v6173_v2, %v745_v22 }
 0x136   : > { %5507 = vmatprep.subr.bf16.mxu0 %v5962_v60  ;;  %v801_v35 = vand.u32 4294901760, %v6243_v4  ;;  %v705_v38 = vand.u32 4294901760, %v704_v16  ;;  %v767_v16 = vsub.f32 %v6197_v24, %v766_v15  ;;  %v781_v32 = vsub.f32 %v6214_v37, %v780_v46 }
 0x137   : > { %v6254_v19 = vsub.f32 %v606_v14, %v655_v6  ;;  %v6257_v20 = vpack.c.bf16 %v655_v6, %v652_v48  ;;  %v6262_v27 = vpack.c.bf16 %v794_v34, %v787_v18  ;;  %v726_v48 = vand.u32 4294901760, %v725_v21 }
 0x138   : > { %v5511_v55 = vpack.c.bf16 %v712_v10, %v705_v38  ;;  %v732_v14 = vsub.f32 %v6153_v50, %v731_v0  ;;  %v754_v0 = vand.u32 4294901760, %v753_v59  ;;  %v747_v21 = vand.u32 4294901760, %v746_v11 }
 0x139   : > { %v808_v31 = vand.u32 4294901760, %v6254_v19  ;;  %5509 = vmatpush3.bf16.msra.mxu0 %v6257_v20  ;;  %v5514_v6 = vpack.c.bf16 %v726_v48, %v719_v17  ;;  %v768_v9 = vand.u32 4294901760, %v767_v16  ;;  %v774_v48 = vsub.f32 %v6204_v30, %v773_v51 }
 0x13a   : > { %5510 = vmatprep.subr.bf16.mxu0 %v5962_v60  ;;  %v733_v57 = vand.u32 4294901760, %v732_v14  ;;  %v5520_v38 = vpack.c.bf16 %v754_v0, %v747_v21  ;;  %v782_v47 = vand.u32 4294901760, %v781_v32  ;;  %v795_v15 = vsub.f32 %v6237_v61, %v794_v34  ;;  %v2993_v32 = vld [vmem:[%s7644_s8 + $0x40] sm:$0xff] }
 0x13b   : > { %v6271_v40 = vpack.c.bf16 %v808_v31, %v801_v35  ;;  %v775_v17 = vand.u32 4294901760, %v774_v48  ;;  %v809_v46 = vsub.f32 %v6254_v19, %v808_v31  ;;  %v802_v51 = vsub.f32 %v6243_v4, %v801_v35 }
 0x13c   : > { %4985 = vmatmul.mubr.f32.vlgmr.msra.gmra.mrb[0].mxu0 %v694_v12  ;;  %v5517_v10 = vpack.c.bf16 %v740_v53, %v733_v57  ;;  %v760_v12 = vsub.f32 %v6195_v23, %v759_v39  ;;  %v788_v39 = vsub.f32 %v6225_v54, %v787_v18  ;;  %v796_v14 = vand.u32 4294901760, %v795_v15 }
 0x13d   : > { %5512 = vmatpush3.bf16.msra.mxu0 %v5511_v55  ;;  %5019 = vmatprep.mubr.msk.f32.mxu0 %vm5963_vm1, %v5964_v1  ;;  %v5526_v53 = vpack.c.bf16 %v782_v47, %v775_v17  ;;  %v803_v34 = vand.u32 4294901760, %v802_v51  ;;  %v5535_v31 = vpack.c.bf16 %v6131_v29, %v6129_v26  ;;  %v5538_v35 = vpack.c.bf16 %v6141_v43, %v6139_v42  ;;  %v608_v47 = vld [vmem:[%s7638_s2] sm:$0x3]  ;;  %v2882_v51 = vld [vmem:[%s7643_s7 + $0x48] sm:$0xff] }
 0x13e   : > { %5513 = vmatprep.subr.bf16.mxu0 %v5962_v60  ;;  %v761_v22 = vand.u32 4294901760, %v760_v12  ;;  %v789_v59 = vand.u32 4294901760, %v788_v39  ;;  %v5541_v11 = vpack.c.bf16 %v6155_v52, %v6153_v50  ;;  %v5544_v26 = vpack.c.bf16 %v6176_v5, %v6173_v2  ;;  %v2985_v5 = vld [vmem:[%s7644_s8] sm:$0xff]  ;;  %v2988_v39 = vld [vmem:[%s7644_s8 + $0x18] sm:$0xff] }
 0x13f   : > { %v5547_v29 = vpack.c.bf16 %v6197_v24, %v6195_v23  ;;  %v5550_v42 = vpack.c.bf16 %v6214_v37, %v6204_v30  ;;  %v5553_v43 = vpack.c.bf16 %v6237_v61, %v6225_v54  ;;  %v5556_v50 = vpack.c.bf16 %v6254_v19, %v6243_v4  ;;  %v2878_v23 = vld [vmem:[%s7643_s7 + $0x28] sm:$0xff]  ;;  %v2987_v61 = vld [vmem:[%s7644_s8 + $0x10] sm:$0xff]  ;;  %v2880_v19 = vld [vmem:[%s7643_s7 + $0x38] sm:$0xff] }
 0x140   : > { %v5523_v55 = vpack.c.bf16 %v768_v9, %v761_v22  ;;  %v5529_v57 = vpack.c.bf16 %v796_v14, %v789_v59  ;;  %v5965_v2 = vmov 0   ;;  %v1252_v24 = vld [vmem:[%s7639_s3 + $0x8] sm:$0xff]  ;;  %v1257_v4 = vld [vmem:[%s7639_s3 + $0x30] sm:$0xff]  ;;  %v1258_v9 = vld [vmem:[%s7639_s3 + $0x38] sm:$0xff] }
 0x141   : > { %5515 = vmatpush3.bf16.msra.mxu0 %v5514_v6  ;;  %v810_v6 = vand.u32 4294901760, %v809_v46  ;;  %5871 = vset.pattern.permute.xlu1 %v5965_v2  ;;  %v1288_v30 = vsel %vm1283_vm2, %v1252_v24, 0  ;;  %v1303_v16 = vsel %vm1283_vm2, %v1257_v4, 0  ;;  %v1259_v22 = vld [vmem:[%s7639_s3 + $0x40] sm:$0xff]  ;;  %v1306_v17 = vsel %vm1283_vm2, %v1258_v9, 0  ;;  %v1260_v59 = vld [vmem:[%s7639_s3 + $0x48] sm:$0xff] }
 0x142   : > { %5516 = vmatprep.subr.bf16.mxu0 %v5962_v60  ;;  %5872 = vset.pattern.permute.xlu0 %v5965_v2  ;;  %v6439_v54 = vand.u32 4294901760, %v1288_v30  ;;  %v6483_v48 = vand.u32 4294901760, %v1303_v16  ;;  %v1262_v2 = vld [vmem:[%s7639_s3 + $0x58] sm:$0xff] }
 0x143   : > { %v5532_v18 = vpack.c.bf16 %v810_v6, %v803_v34  ;;  %3003 = vperm.xlu0 %5872, %v2985_v5  }
 0x145   : > { %5518 = vmatpush3.bf16.msra.mxu0 %v5517_v10  ;;  %v2876_v10 = vld [vmem:[%s7643_s7 + $0x18] sm:$0xff] }
 0x146   : > { %5519 = vmatprep.subr.bf16.mxu0 %v5962_v60 }
 0x149   : > { %5521 = vmatpush3.bf16.msra.mxu0 %v5520_v38 }
 0x14a   : > { %5522 = vmatprep.subr.bf16.mxu0 %v5962_v60 }
 0x14d   : > { %5524 = vmatpush3.bf16.msra.mxu0 %v5523_v55 }
 0x14e   : > { %5525 = vmatprep.subr.bf16.mxu0 %v5962_v60 }
 0x151   : > { %5527 = vmatpush3.bf16.msra.mxu0 %v5526_v53  ;;  %v1309_v53 = vsel %vm1283_vm2, %v1259_v22, 0 }
 0x152   : > { %5528 = vmatprep.subr.bf16.mxu0 %v5962_v60 }
 0x155   : > { %5530 = vmatpush3.bf16.msra.mxu0 %v5529_v57 }
 0x156   : > { %5531 = vmatprep.subr.bf16.mxu0 %v5962_v60 }
 0x159   : > { %5533 = vmatpush3.bf16.msra.mxu0 %v5532_v18 }
 0x15a   : > { %5534 = vmatprep.subr.bf16.mxu0 %v5962_v60 }
 0x15c   : > { %5020 = vmatmul.mubr.f32.vlgmr.msra.gmra.mrb[0].mxu0 %v6181_v8 }
 0x15d   : > { %5536 = vmatpush3.bf16.msra.mxu0 %v5535_v31  ;;  %5054 = vmatprep.mubr.msk.f32.mxu0 %vm5963_vm1, %v5964_v1  ;;  %v6511_v31 = vsub.f32 %v1303_v16, %v6483_v48  ;;  %v1265_v16 = vld [vmem:[%s7639_s3 + $0x70] sm:$0xff] }
 0x15e   : > { %5537 = vmatprep.subr.bf16.mxu0 %v5962_v60 }
 0x161   : > { %5539 = vmatpush3.bf16.msra.mxu0 %v5538_v35  ;;  %v6513_v35 = vand.u32 4294901760, %v1306_v17 }
 0x162   : > { %5540 = vmatprep.subr.bf16.mxu0 %v5962_v60 }
 0x165   : > { %5542 = vmatpush3.bf16.msra.mxu0 %v5541_v11  ;;  %v1261_v11 = vld [vmem:[%s7639_s3 + $0x50] sm:$0xff] }
 0x166   : > { %5543 = vmatprep.subr.bf16.mxu0 %v5962_v60 }
 0x169   : > { %5545 = vmatpush3.bf16.msra.mxu0 %v5544_v26 }
 0x16a   : > { %5546 = vmatprep.subr.bf16.mxu0 %v5962_v60 }
 0x16d   : > { %5548 = vmatpush3.bf16.msra.mxu0 %v5547_v29 }
 0x16e   : > { %5549 = vmatprep.subr.bf16.mxu0 %v5962_v60 }
 0x171   : > { %5551 = vmatpush3.bf16.msra.mxu0 %v5550_v42  ;;  %v6520_v42 = vand.u32 4294901760, %v1309_v53 }
 0x172   : > { %5552 = vmatprep.subr.bf16.mxu0 %v5962_v60 }
 0x175   : > { %5554 = vmatpush3.bf16.msra.mxu0 %v5553_v43  ;;  %v1312_v43 = vsel %vm1283_vm2, %v1260_v59, 0 }
 0x176   : > { %5555 = vmatprep.subr.bf16.mxu0 %v5962_v60 }
 0x179   : > { %5557 = vmatpush3.bf16.msra.mxu0 %v5556_v50  ;;  %v2877_v50 = vld [vmem:[%s7643_s7 + $0x20] sm:$0xff] }
 0x17a   : > { %5558 = vmatprep.subr.bf16.mxu0 %v5962_v60 }
 0x17c   : > { %5055 = vmatmul.mubr.f32.vlgmr.msra.gmra.mrb[0].mxu0 %v6202_v28  ;;  %v2875_v28 = vld [vmem:[%s7643_s7 + $0x10] sm:$0xff] }
 0x17d   : > { %5560 = vmatpush3.bf16.msra.mxu0 %v6133_v33  ;;  %5089 = vmatprep.mubr.msk.f32.mxu0 %vm5963_vm1, %v5964_v1 }
 0x17e   : > { %5561 = vmatprep.subr.bf16.mxu0 %v5962_v60 }
 0x181   : > { %5563 = vmatpush3.bf16.msra.mxu0 %v6143_v44 }
 0x182   : > { %5564 = vmatprep.subr.bf16.mxu0 %v5962_v60 }
 0x185   : > { %5566 = vmatpush3.bf16.msra.mxu0 %v6159_v56 }
 0x186   : > { %5567 = vmatprep.subr.bf16.mxu0 %v5962_v60 }
 0x189   : > { %5569 = vmatpush3.bf16.msra.mxu0 %v6179_v7 }
 0x18a   : > { %5570 = vmatprep.subr.bf16.mxu0 %v5962_v60 }
 0x18d   : > { %5572 = vmatpush3.bf16.msra.mxu0 %v6199_v25 }
 0x18e   : > { %5573 = vmatprep.subr.bf16.mxu0 %v5962_v60 }
 0x191   : > { %5575 = vmatpush3.bf16.msra.mxu0 %v6220_v41 }
 0x192   : > { %5576 = vmatprep.subr.bf16.mxu0 %v5962_v60 }
 0x195   : > { %5578 = vmatpush3.bf16.msra.mxu0 %v6239_v62 }
 0x196   : > { %5579 = vmatprep.subr.bf16.mxu0 %v5962_v60 }
 0x199   : > { %5581 = vmatpush3.bf16.msra.mxu0 %v6257_v20 }
 0x19a   : > { %5582 = vmatprep.subr.bf16.mxu0 %v5962_v60 }
 0x19c   : > { %5090 = vmatmul.mubr.f32.vlgmr.msra.gmra.mrb[0].mxu0 %v692_v49  ;;  %v1255_v49 = vld [vmem:[%s7639_s3 + $0x20] sm:$0xff] }
 0x19d   : > { %5584 = vmatpush3.bf16.msra.mxu0 %v6149_v45  ;;  %5124 = vmatprep.mubr.msk.f32.mxu0 %vm5963_vm1, %v5964_v1 }
 0x19e   : > { %5585 = vmatprep.subr.bf16.mxu0 %v5962_v60 }
 0x1a1   : > { %5587 = vmatpush3.bf16.msra.mxu0 %v6170_v63  ;;  %v2873_v63 = vld [vmem:[%s7643_s7] sm:$0xff] }
 0x1a2   : > { %5588 = vmatprep.subr.bf16.mxu0 %v5962_v60  ;;  %2891 = vperm.xlu1 %5871, %v2873_v63   ;;  %v1315_v63 = vsel %vm1283_vm2, %v1261_v11, 0 }
 0x1a5   : > { %5590 = vmatpush3.bf16.msra.mxu0 %v6189_v13  ;;  %v2986_v13 = vld [vmem:[%s7644_s8 + $0x8] sm:$0xff] }
 0x1a6   : > { %5591 = vmatprep.subr.bf16.mxu0 %v5962_v60 }
 0x1a9   : > { %5593 = vmatpush3.bf16.msra.mxu0 %v6212_v36  ;;  %v2991_v36 = vld [vmem:[%s7644_s8 + $0x30] sm:$0xff] }
 0x1aa   : > { %5594 = vmatprep.subr.bf16.mxu0 %v5962_v60 }
 0x1ad   : > { %5596 = vmatpush3.bf16.msra.mxu0 %v6230_v58  ;;  %v1256_v58 = vld [vmem:[%s7639_s3 + $0x28] sm:$0xff] }
 0x1ae   : > { %5597 = vmatprep.subr.bf16.mxu0 %v5962_v60 }
 0x1b1   : > { %5599 = vmatpush3.bf16.msra.mxu0 %v6241_v3 }
 0x1b2   : > { %5600 = vmatprep.subr.bf16.mxu0 %v5962_v60 }
 0x1b5   : > { %5602 = vmatpush3.bf16.msra.mxu0 %v6262_v27  ;;  %v1300_v27 = vsel %vm1283_vm2, %v1256_v58, 0 }
 0x1b6   : > { %5603 = vmatprep.subr.bf16.mxu0 %v5962_v60  ;;  %v6478_v38 = vand.u32 4294901760, %v1300_v27 }
 0x1b8   : > { %v6508_v57 = vsub.f32 %v1300_v27, %v6478_v38 }
 0x1b9   : > { %5605 = vmatpush3.bf16.msra.mxu0 %v6271_v40  ;;  %v6459_v40 = vsub.f32 %v1288_v30, %v6439_v54  ;;  %v6552_v30 = vsub.f32 %v1309_v53, %v6520_v42 }
 0x1ba   : > { %5606 = vmatprep.subr.bf16.mxu0 %v5962_v60 }
 0x1bb   : > { %v1414_v15 = vand.u32 4294901760, %v6459_v40  ;;  %v1484_v22 = vand.u32 4294901760, %v6552_v30 }
 0x1bc   : > { %5125 = vmatmul.mubr.f32.vlgmr.msra.gmra.mrb[0].mxu0 %v6181_v8 }
 0x1bd   : > { %5608 = vmatpush3.bf16.msra.mxu0 %v6133_v33  ;;  %5159 = vmatprep.mubr.msk.f32.mxu0 %vm5963_vm1, %v5964_v1  ;;  %v1251_v1 = vld [vmem:[%s7639_s3] sm:$0xff]  ;;  %v1415_v26 = vsub.f32 %v6459_v40, %v1414_v15 }
 0x1be   : > { %5609 = vmatprep.subr.bf16.mxu0 %v5962_v60  ;;  %v1285_v33 = vsel %vm1283_vm2, %v1251_v1, 0 }
 0x1c1   : > { %5611 = vmatpush3.bf16.msra.mxu0 %v6143_v44  ;;  %v6394_v44 = vand.u32 4294901760, %v1285_v33 }
 0x1c2   : > { %5612 = vmatprep.subr.bf16.mxu0 %v5962_v60 }
 0x1c3   : > { %v6397_v45 = vsub.f32 %v1285_v33, %v6394_v44 }
 0x1c5   : > { %5614 = vmatpush3.bf16.msra.mxu0 %v6159_v56  ;;  %v1404_v52 = vand.u32 4294901760, %v6397_v45 }
 0x1c6   : > { %5615 = vmatprep.subr.bf16.mxu0 %v5962_v60 }
 0x1c7   : > { %5242 = vmatprep.mubr.f32.mxu1 %v1404_v52 }
 0x1c9   : > { %5617 = vmatpush3.bf16.msra.mxu0 %v6179_v7  ;;  %v2874_v7 = vld [vmem:[%s7643_s7 + $0x8] sm:$0xff] }
 0x1ca   : > { %5618 = vmatprep.subr.bf16.mxu0 %v5962_v60  ;;  %2896 = vperm.xlu1 %5871, %v2874_v7   ;;  %v1464_v7 = vand.u32 4294901760, %v6511_v31 }
 0x1cd   : > { %5620 = vmatpush3.bf16.msra.mxu0 %v6199_v25  ;;  %v1253_v25 = vld [vmem:[%s7639_s3 + $0x10] sm:$0xff] }
 0x1ce   : > { %5621 = vmatprep.subr.bf16.mxu0 %v5962_v60  ;;  %3008 = vperm.xlu1 %5871, %v2986_v13   ;;  %v1291_v37 = vsel %vm1283_vm2, %v1253_v25, 0  ;;  %v6541_v13 = vand.u32 4294901760, %v1312_v43  ;;  %v1416_v25 = vand.u32 4294901760, %v1415_v26 }
 0x1d0   : > { %v6579_v27 = vsub.f32 %v1312_v43, %v6541_v13 }
 0x1d1   : > { %5623 = vmatpush3.bf16.msra.mxu0 %v6220_v41  ;;  %v1254_v41 = vld [vmem:[%s7639_s3 + $0x18] sm:$0xff] }
 0x1d2   : > { %5624 = vmatprep.subr.bf16.mxu0 %v5962_v60  ;;  %2901 = vperm.xlu1 %5871, %v2875_v28   ;;  %v1294_v3 = vsel %vm1283_vm2, %v1254_v41, 0  ;;  %v6557_v41 = vand.u32 4294901760, %v1315_v63  ;;  %v1494_v26 = vand.u32 4294901760, %v6579_v27 }
 0x1d3   : > { %v6461_v0 = vand.u32 4294901760, %v1294_v3 }
 0x1d4   : > { %v6595_v53 = vsub.f32 %v1315_v63, %v6557_v41 }
 0x1d5   : > { %5626 = vmatpush3.bf16.msra.mxu0 %v6239_v62  ;;  %v6447_v62 = vand.u32 4294901760, %v1291_v37  ;;  %v6490_v55 = vsub.f32 %v1294_v3, %v6461_v0  ;;  %v1264_v3 = vld [vmem:[%s7639_s3 + $0x68] sm:$0xff] }
 0x1d6   : > { %5627 = vmatprep.subr.bf16.mxu0 %v5962_v60  ;;  %v1405_v60 = vsub.f32 %v6397_v45, %v1404_v52  ;;  %3013 = vperm.xlu1 %5871, %v2987_v61   ;;  %v1504_v63 = vand.u32 4294901760, %v6595_v53 }
 0x1d7   : > { %v6468_v21 = vsub.f32 %v1291_v37, %v6447_v62  ;;  %v1434_v29 = vand.u32 4294901760, %v6490_v55 }
 0x1d8   : > { %v1406_v56 = vand.u32 4294901760, %v1405_v60  ;;  %v2995_v60 = vld [vmem:[%s7644_s8 + $0x50] sm:$0xff] }
 0x1d9   : > { %5629 = vmatpush3.bf16.msra.mxu0 %v6257_v20  ;;  %v1297_v20 = vsel %vm1283_vm2, %v1255_v49, 0  ;;  %v1424_v14 = vand.u32 4294901760, %v6468_v21  ;;  %v1435_v28 = vsub.f32 %v6490_v55, %v1434_v29  ;;  %v1318_v49 = vsel %vm1283_vm2, %v1262_v2, 0 }
 0x1da   : > { %v6470_v12 = vand.u32 4294901760, %v1297_v20  ;;  %2906 = vperm.xlu1 %5871, %v2876_v10   ;;  %v2990_v10 = vld [vmem:[%s7644_s8 + $0x28] sm:$0xff] }
 0x1db   : > { %v1425_v33 = vsub.f32 %v6468_v21, %v1424_v14 }
 0x1dc   : > { %5160 = vmatmul.mubr.f32.vlgmr.msra.gmra.mrb[0].mxu0 %v6181_v8  ;;  %v2989_v8 = vld [vmem:[%s7644_s8 + $0x20] sm:$0xff]  ;;  %v6498_v46 = vsub.f32 %v1297_v20, %v6470_v12 }
 0x1dd   : > { %5164 = vmatprep.mubr.f32.mxu0 %v1406_v56  ;;  %3023 = vperm.xlu0 %5872, %v2989_v8   ;;  %v1454_v56 = vand.u32 4294901760, %v6508_v57  ;;  %v6539_v8 = vsub.f32 %v1306_v17, %v6513_v35  ;;  %v2884_v17 = vld [vmem:[%s7643_s7 + $0x58] sm:$0xff] }
 0x1de   : > { %3018 = vperm.xlu1 %5871, %v2988_v39   ;;  %v1444_v52 = vand.u32 4294901760, %v6498_v46 }
 0x1df   : > { %v1455_v4 = vsub.f32 %v6508_v57, %v1454_v56  ;;  %v1474_v20 = vand.u32 4294901760, %v6539_v8 }
 0x1e0   : > { %v1445_v37 = vsub.f32 %v6498_v46, %v1444_v52 }
 0x1e1   : > { %2916 = vperm.xlu0 %5872, %v2878_v23   ;;  %v1263_v23 = vld [vmem:[%s7639_s3 + $0x60] sm:$0xff]  ;;  %v1475_v11 = vsub.f32 %v6539_v8, %v1474_v20 }
 0x1e2   : > { %2911 = vperm.xlu1 %5871, %v2877_v50   ;;  %v1321_v61 = vsel %vm1283_vm2, %v1263_v23, 0  ;;  %v1446_v39 = vand.u32 4294901760, %v1445_v37  ;;  %v1485_v50 = vsub.f32 %v6552_v30, %v1484_v22 }
 0x1e3   : > { %v6597_v59 = vand.u32 4294901760, %v1321_v61  ;;  %v1476_v23 = vand.u32 4294901760, %v1475_v11  ;;  %v2888_v11 = vld [vmem:[%s7643_s7 + $0x78] sm:$0xff] }
 0x1e5   : > { %3033 = vperm.xlu0 %5872, %v2991_v36   ;;  %v1426_v36 = vand.u32 4294901760, %v1425_v33 }
 0x1e6   : > { %3028 = vperm.xlu1 %5871, %v2990_v10  }
 0x1e9   : > { %2926 = vperm.xlu0 %5872, %v2880_v19   ;;  %v1465_v19 = vsub.f32 %v6511_v31, %v1464_v7 }
 0x1ed   : > { %3043 = vperm.xlu0 %5872, %v2993_v32   ;;  %v1436_v32 = vand.u32 4294901760, %v1435_v28  ;;  %v1495_v28 = vsub.f32 %v6579_v27, %v1494_v26 }
 0x1f1   : > { %2936 = vperm.xlu0 %5872, %v2882_v51  }
 0x1f5   : > { %3053 = vperm.xlu0 %5872, %v2995_v60   ;;  %v2879_v60 = vld [vmem:[%s7643_s7 + $0x30] sm:$0xff] }
 0x1f6   : > { %2921 = vperm.xlu1 %5871, %v2879_v60   ;;  %v2883_v60 = vld [vmem:[%s7643_s7 + $0x50] sm:$0xff] }
 0x1f9   : > { %2946 = vperm.xlu0 %5872, %v2884_v17   ;;  %v2881_v17 = vld [vmem:[%s7643_s7 + $0x40] sm:$0xff] }
 0x2af   : > { %v1246_v6 = vpop.f32.mrb[0].mxu0 }
 0x2b0   : > { %v5654_v34 = vadd.f32 %v1246_v6, %v608_v47  ;;  %v5161_v18 = vpop.f32.mrb[1].mxu0  ;;  %v6589_v47 = vand.u32 4294901760, %v1318_v49  ;;  %v1327_v6 = vsel %vm1283_vm2, %v1265_v16, 0  ;;  %v2886_v16 = vld [vmem:[%s7643_s7 + $0x68] sm:$0xff] }
 0x2b1   : > { %v1466_v18 = vand.u32 4294901760, %v1465_v19  ;;  %v6627_v2 = vand.u32 4294901760, %v1327_v6 }
 0x2b2   : > { %v1250_v1 = vmax.f32 %v5654_v34, 0.0  ;;  %v1266_v34 = vld [vmem:[%s7639_s3 + $0x78] sm:$0xff] }
 0x2b3   : > { %v6651_v19 = vsub.f32 %v1327_v6, %v6627_v2 }
 0x2b4   : > { %v1334_v5 = vsel %vm1332_vm3, %v1250_v1, 0  ;;  %v6615_v1 = vsub.f32 %v1318_v49, %v6589_v47 }
 0x2b5   : > { %v6546_v24 = vand.u32 4294901760, %v1334_v5 }
 0x2b7   : > { %v6561_v58 = vsub.f32 %v1334_v5, %v6546_v24  ;;  %5162 = vmatprep.subr.mxu0 %v6546_v24  ;;  %5240 = vmatprep.subr.mxu1 %v6546_v24  ;;  %v1330_v5 = vsel %vm1283_vm2, %v1266_v34, 0 }
 0x2b8   : > { %5163 = vmatpush3.msra.mxu0 %v6546_v24  ;;  %5241 = vmatpush3.msra.mxu1 %v6546_v24  ;;  %v6641_v49 = vand.u32 4294901760, %v1330_v5 }
 0x2b9   : > { %5165 = vmatmul.mubr.f32.vlgmr.msra.gmra.mrb[2].mxu0 %v1416_v25  ;;  %5243 = vmatmul.mubr.f32.vlgmr.msra.gmra.mrb[0].mxu1 %v1414_v15  ;;  %v1565_v9 = vand.u32 4294901760, %v6561_v58  ;;  %v1324_v15 = vsel %vm1283_vm2, %v1264_v3, 0  ;;  %v2997_v25 = vld [vmem:[%s7644_s8 + $0x60] sm:$0xff]  ;;  %v1505_v3 = vsub.f32 %v6595_v53, %v1504_v63 }
 0x2ba   : > { %5167 = vmatprep.mubr.f32.mxu0 %v1426_v36  ;;  %5245 = vmatprep.mubr.f32.mxu1 %v1424_v14  ;;  %v1456_v14 = vand.u32 4294901760, %v1455_v4  ;;  %v6617_v33 = vand.u32 4294901760, %v1324_v15  ;;  %v1514_v36 = vand.u32 4294901760, %v6615_v1 }
 0x2bb   : > { %5266 = vmatprep.subr.mxu1 %v1565_v9  ;;  %v1566_v51 = vsub.f32 %v6561_v58, %v1565_v9  ;;  %3063 = vperm.xlu0 %5872, %v2997_v25   ;;  %v2998_v25 = vld [vmem:[%s7644_s8 + $0x68] sm:$0xff] }
 0x2bc   : > { %5267 = vmatpush3.msra.mxu1 %v1565_v9  ;;  %v6639_v37 = vsub.f32 %v1324_v15, %v6617_v33  ;;  %v1515_v10 = vsub.f32 %v6615_v1, %v1514_v36  ;;  %v1544_v15 = vand.u32 4294901760, %v6651_v19 }
 0x2bd   : > { %5168 = vmatmul.mubr.f32.gmra.mrb[4].mxu0 %v1436_v32  ;;  %5246 = vmatmul.mubr.f32.gmra.mrb[2].mxu1 %v1434_v29  ;;  %v1567_v43 = vand.u32 4294901760, %v1566_v51  ;;  %v6625_v29 = vsub.f32 %v1321_v61, %v6597_v59  ;;  %v1486_v61 = vand.u32 4294901760, %v1485_v50  ;;  %v6661_v32 = vsub.f32 %v1330_v5, %v6641_v49  ;;  %v2999_v51 = vld [vmem:[%s7644_s8 + $0x70] sm:$0xff]  ;;  %v2996_v5 = vld [vmem:[%s7644_s8 + $0x58] sm:$0xff] }
 0x2be   : > { %5292 = vmatprep.subr.mxu1 %v6546_v24  ;;  %5170 = vmatprep.mubr.f32.mxu0 %v1446_v39  ;;  %v1534_v9 = vand.u32 4294901760, %v6639_v37  ;;  %v1516_v6 = vand.u32 4294901760, %v1515_v10 }
 0x2bf   : > { %5188 = vmatprep.subr.mxu0 %v1567_v43  ;;  %5248 = vmatprep.mubr.f32.mxu1 %v1444_v52  ;;  %v2992_v52 = vld [vmem:[%s7644_s8 + $0x38] sm:$0xff]  ;;  %v1524_v4 = vand.u32 4294901760, %v6625_v29 }
 0x2c0   : > { %5189 = vmatpush3.msra.mxu0 %v1567_v43  ;;  %3038 = vperm.xlu1 %5871, %v2992_v52   ;;  %v1535_v34 = vsub.f32 %v6639_v37, %v1534_v9 }
 0x2c1   : > { %5171 = vmatmul.mubr.f32.gmra.mrb[6].mxu0 %v1456_v14  ;;  %5214 = vmatprep.subr.mxu0 %v6561_v58  ;;  %v1525_v39 = vsub.f32 %v6625_v29, %v1524_v4  ;;  %v2994_v14 = vld [vmem:[%s7644_s8 + $0x48] sm:$0xff] }
 0x2c2   : > { %5249 = vmatmul.mubr.f32.gmra.mrb[4].mxu1 %v1454_v56  ;;  %5173 = vmatprep.mubr.f32.mxu0 %v1466_v18  ;;  %v1496_v56 = vand.u32 4294901760, %v1495_v28  ;;  %v1536_v43 = vand.u32 4294901760, %v1535_v34  ;;  %v2887_v28 = vld [vmem:[%s7643_s7 + $0x70] sm:$0xff]  ;;  %v1276_v34 = vld [vmem:[%s7640_s4 + $0x48] sm:$0xff] }
 0x2c3   : > { %5251 = vmatprep.mubr.f32.mxu1 %v1464_v7  ;;  %v1506_v7 = vand.u32 4294901760, %v1505_v3  ;;  %2956 = vperm.xlu0 %5872, %v2886_v16   ;;  %v1526_v18 = vand.u32 4294901760, %v1525_v39  ;;  %v1274_v3 = vld [vmem:[%s7640_s4 + $0x38] sm:$0xff]  ;;  %v1273_v16 = vld [vmem:[%s7640_s4 + $0x30] sm:$0xff] }
 0x2c4   : > { %2931 = vperm.xlu1 %5871, %v2881_v17  }
 0x2c5   : > { %5174 = vmatmul.mubr.f32.gmra.mrb[8].mxu0 %v1476_v23  ;;  %v2885_v23 = vld [vmem:[%s7643_s7 + $0x60] sm:$0xff] }
 0x2c6   : > { %5252 = vmatmul.mubr.f32.gmra.mrb[6].mxu1 %v1474_v20  ;;  %5176 = vmatprep.mubr.f32.mxu0 %v1486_v61  ;;  %v1554_v20 = vand.u32 4294901760, %v6661_v32 }
 0x2c7   : > { %5254 = vmatprep.mubr.f32.mxu1 %v1484_v22  ;;  %v1545_v22 = vsub.f32 %v6651_v19, %v1544_v15  ;;  %3073 = vperm.xlu0 %5872, %v2999_v51  }
 0x2c8   : > { %3048 = vperm.xlu1 %5871, %v2994_v14   ;;  %v1555_v50 = vsub.f32 %v6661_v32, %v1554_v20 }
 0x2c9   : > { %5177 = vmatmul.mubr.f32.gmra.mrb[10].mxu0 %v1496_v56 }
 0x2ca   : > { %5255 = vmatmul.mubr.f32.gmra.mrb[8].mxu1 %v1494_v26  ;;  %5179 = vmatprep.mubr.f32.mxu0 %v1506_v7  ;;  %v1546_v26 = vand.u32 4294901760, %v1545_v22 }
 0x2cb   : > { %5257 = vmatprep.mubr.f32.mxu1 %v1504_v63  ;;  %2966 = vperm.xlu0 %5872, %v2888_v11   ;;  %v1556_v63 = vand.u32 4294901760, %v1555_v50 }
 0x2cc   : > { %2941 = vperm.xlu1 %5871, %v2883_v60  }
 0x2cd   : > { %5180 = vmatmul.mubr.f32.gmra.mrb[12].mxu0 %v1516_v6 }
 0x2ce   : > { %5258 = vmatmul.mubr.f32.gmra.mrb[10].mxu1 %v1514_v36  ;;  %5182 = vmatprep.mubr.f32.mxu0 %v1526_v18  ;;  %v1275_v18 = vld [vmem:[%s7640_s4 + $0x40] sm:$0xff] }
 0x2cf   : > { %5260 = vmatprep.mubr.f32.mxu1 %v1524_v4 }
 0x2d0   : > { %3058 = vperm.xlu1 %5871, %v2996_v5  }
 0x2d1   : > { %5183 = vmatmul.mubr.f32.gmra.mrb[14].mxu0 %v1536_v43 }
 0x2d2   : > { %5261 = vmatmul.mubr.f32.gmra.mrb[12].mxu1 %v1534_v9  ;;  %5185 = vmatprep.mubr.f32.mxu0 %v1546_v26 }
 0x2d3   : > { %5263 = vmatprep.mubr.f32.mxu1 %v1544_v15 }
 0x2d4   : > { %2951 = vperm.xlu1 %5871, %v2885_v23  }
 0x2d5   : > { %5186 = vmatmul.mubr.f32.gmra.mrb[16].mxu0 %v1556_v63 }
 0x2d6   : > { %5264 = vmatmul.mubr.f32.gmra.mrb[14].mxu1 %v1554_v20  ;;  %5190 = vmatprep.mubr.f32.mxu0 %v6394_v44 }
 0x2d7   : > { %5268 = vmatprep.mubr.f32.mxu1 %v6394_v44 }
 0x2d8   : > { %3068 = vperm.xlu1 %5871, %v2998_v25  }
 0x2d9   : > { %5191 = vmatmul.mubr.f32.vlgmr.msra.gmra.mrb[2].mxu0 %v6439_v54 }
 0x2da   : > { %5215 = vmatpush3.msra.mxu0 %v6561_v58  ;;  %5269 = vmatmul.mubr.f32.vlgmr.msra.gmra.mrb[0].mxu1 %v6439_v54  ;;  %v1272_v58 = vld [vmem:[%s7640_s4 + $0x28] sm:$0xff] }
 0x2db   : > { %5293 = vmatpush3.msra.mxu1 %v6546_v24  ;;  %5193 = vmatprep.mubr.f32.mxu0 %v6447_v62  ;;  %v3000_v24 = vld [vmem:[%s7644_s8 + $0x78] sm:$0xff] }
 0x2dc   : > { %5271 = vmatprep.mubr.f32.mxu1 %v6447_v62  ;;  %2961 = vperm.xlu1 %5871, %v2887_v28   ;;  %v1278_v28 = vld [vmem:[%s7640_s4 + $0x58] sm:$0xff] }
 0x2dd   : > { %5194 = vmatmul.mubr.f32.gmra.mrb[4].mxu0 %v6461_v0 }
 0x2de   : > { %5272 = vmatmul.mubr.f32.gmra.mrb[2].mxu1 %v6461_v0  ;;  %5196 = vmatprep.mubr.f32.mxu0 %v6470_v12 }
 0x2df   : > { %5274 = vmatprep.mubr.f32.mxu1 %v6470_v12 }
 0x2e0   : > { %3078 = vperm.xlu1 %5871, %v3000_v24  }
 0x2e1   : > { %5197 = vmatmul.mubr.f32.gmra.mrb[6].mxu0 %v6478_v38 }
 0x2e2   : > { %5275 = vmatmul.mubr.f32.gmra.mrb[4].mxu1 %v6478_v38  ;;  %5199 = vmatprep.mubr.f32.mxu0 %v6483_v48 }
 0x2e3   : > { %5277 = vmatprep.mubr.f32.mxu1 %v6483_v48 }
 0x2e5   : > { %5200 = vmatmul.mubr.f32.gmra.mrb[8].mxu0 %v6513_v35 }
 0x2e6   : > { %5278 = vmatmul.mubr.f32.gmra.mrb[6].mxu1 %v6513_v35  ;;  %5202 = vmatprep.mubr.f32.mxu0 %v6520_v42 }
 0x2e7   : > { %5280 = vmatprep.mubr.f32.mxu1 %v6520_v42 }
 0x2e9   : > { %5203 = vmatmul.mubr.f32.gmra.mrb[10].mxu0 %v6541_v13 }
 0x2ea   : > { %5281 = vmatmul.mubr.f32.gmra.mrb[8].mxu1 %v6541_v13  ;;  %5205 = vmatprep.mubr.f32.mxu0 %v6557_v41 }
 0x2eb   : > { %5283 = vmatprep.mubr.f32.mxu1 %v6557_v41 }
 0x2ed   : > { %5206 = vmatmul.mubr.f32.gmra.mrb[12].mxu0 %v6589_v47 }
 0x2ee   : > { %5284 = vmatmul.mubr.f32.gmra.mrb[10].mxu1 %v6589_v47  ;;  %5208 = vmatprep.mubr.f32.mxu0 %v6597_v59 }
 0x2ef   : > { %5286 = vmatprep.mubr.f32.mxu1 %v6597_v59 }
 0x2f1   : > { %5209 = vmatmul.mubr.f32.gmra.mrb[14].mxu0 %v6617_v33 }
 0x2f2   : > { %5287 = vmatmul.mubr.f32.gmra.mrb[12].mxu1 %v6617_v33  ;;  %5211 = vmatprep.mubr.f32.mxu0 %v6627_v2 }
 0x2f3   : > { %5289 = vmatprep.mubr.f32.mxu1 %v6627_v2 }
 0x2f5   : > { %5212 = vmatmul.mubr.f32.gmra.mrb[16].mxu0 %v6641_v49 }
 0x2f6   : > { %5290 = vmatmul.mubr.f32.gmra.mrb[14].mxu1 %v6641_v49  ;;  %5216 = vmatprep.mubr.f32.mxu0 %v6397_v45  ;;  %v1267_v45 = vld [vmem:[%s7640_s4] sm:$0xff] }
 0x2f7   : > { %5294 = vmatprep.mubr.f32.mxu1 %v6394_v44  ;;  %v1268_v44 = vld [vmem:[%s7640_s4 + $0x8] sm:$0xff] }
 0x2f9   : > { %5217 = vmatmul.mubr.f32.vlgmr.msra.gmra.mrb[2].mxu0 %v6459_v40 }
 0x2fa   : > { %5295 = vmatmul.mubr.f32.vlgmr.msra.gmra.mrb[0].mxu1 %v6439_v54  ;;  %5219 = vmatprep.mubr.f32.mxu0 %v6468_v21 }
 0x2fb   : > { %5297 = vmatprep.mubr.f32.mxu1 %v6447_v62 }
 0x2fd   : > { %5220 = vmatmul.mubr.f32.gmra.mrb[4].mxu0 %v6490_v55  ;;  %v1269_v55 = vld [vmem:[%s7640_s4 + $0x10] sm:$0xff] }
 0x2fe   : > { %5298 = vmatmul.mubr.f32.gmra.mrb[2].mxu1 %v6461_v0  ;;  %5222 = vmatprep.mubr.f32.mxu0 %v6498_v46 }
 0x2ff   : > { %5300 = vmatprep.mubr.f32.mxu1 %v6470_v12 }
 0x301   : > { %5223 = vmatmul.mubr.f32.gmra.mrb[6].mxu0 %v6508_v57 }
 0x302   : > { %5301 = vmatmul.mubr.f32.gmra.mrb[4].mxu1 %v6478_v38  ;;  %5225 = vmatprep.mubr.f32.mxu0 %v6511_v31  ;;  %v1270_v38 = vld [vmem:[%s7640_s4 + $0x18] sm:$0xff] }
 0x303   : > { %5303 = vmatprep.mubr.f32.mxu1 %v6483_v48 }
 0x305   : > { %5226 = vmatmul.mubr.f32.gmra.mrb[8].mxu0 %v6539_v8 }
 0x306   : > { %5304 = vmatmul.mubr.f32.gmra.mrb[6].mxu1 %v6513_v35  ;;  %5228 = vmatprep.mubr.f32.mxu0 %v6552_v30 }
 0x307   : > { %5306 = vmatprep.mubr.f32.mxu1 %v6520_v42 }
 0x309   : > { %5229 = vmatmul.mubr.f32.gmra.mrb[10].mxu0 %v6579_v27 }
 0x30a   : > { %5307 = vmatmul.mubr.f32.gmra.mrb[8].mxu1 %v6541_v13  ;;  %5231 = vmatprep.mubr.f32.mxu0 %v6595_v53  ;;  %v1271_v53 = vld [vmem:[%s7640_s4 + $0x20] sm:$0xff] }
 0x30b   : > { %5309 = vmatprep.mubr.f32.mxu1 %v6557_v41 }
 0x30d   : > { %5232 = vmatmul.mubr.f32.gmra.mrb[12].mxu0 %v6615_v1 }
 0x30e   : > { %5310 = vmatmul.mubr.f32.gmra.mrb[10].mxu1 %v6589_v47  ;;  %5234 = vmatprep.mubr.f32.mxu0 %v6625_v29 }
 0x30f   : > { %5312 = vmatprep.mubr.f32.mxu1 %v6597_v59 }
 0x311   : > { %5235 = vmatmul.mubr.f32.gmra.mrb[14].mxu0 %v6639_v37 }
 0x312   : > { %5313 = vmatmul.mubr.f32.gmra.mrb[12].mxu1 %v6617_v33  ;;  %5237 = vmatprep.mubr.f32.mxu0 %v6651_v19 }
 0x313   : > { %5315 = vmatprep.mubr.f32.mxu1 %v6627_v2 }
 0x315   : > { %5238 = vmatmul.mubr.f32.gmra.mrb[16].mxu0 %v6661_v32 }
 0x316   : > { %5316 = vmatmul.mubr.f32.gmra.mrb[14].mxu1 %v6641_v49 }
 0x3cc   : > { %v5218_v54 = vpop.f32.mrb[2].mxu0 }
 0x3cd   : > { %v5655_v62 = vadd.f32 %v5218_v54, %v1268_v44  ;;  %v5296_v40 = vpop.f32.mrb[0].mxu1  ;;  %v1798_v0 = vpop.f32.mrb[3].mxu0  ;;  %v1277_v54 = vld [vmem:[%s7640_s4 + $0x50] sm:$0xff] }
 0x3ce   : > { %v5657_v21 = vadd.f32 %v1798_v0, %v1267_v45  ;;  %v2333_v12 = vpop.f32.mrb[1].mxu1 }
 0x3cf   : > { %v5656_v48 = vadd.f32 %v5655_v62, %v5296_v40 }
 0x3d0   : > { %v5658_v46 = vadd.f32 %v5657_v21, %v2333_v12  ;;  %v5221_v57 = vpop.f32.mrb[4].mxu0 }
 0x3d1   : > { %v2428_v31 = vsub.f32 0.0, %v5656_v48  ;;  %v5659_v35 = vadd.f32 %v5221_v57, %v1270_v38  ;;  %v5299_v42 = vpop.f32.mrb[2].mxu1  ;;  %v1812_v8 = vpop.f32.mrb[5].mxu0 }
 0x3d2   : > { %v2427_v13 = vsub.f32 0.0, %v5658_v46  ;;  %v5661_v30 = vadd.f32 %v1812_v8, %v1269_v55  ;;  %v2345_v41 = vpop.f32.mrb[3].mxu1  ;;  %v1280_v8 = vld [vmem:[%s7640_s4 + $0x68] sm:$0xff] }
 0x3d3   : > { %v2445_v27 = vmul.f32 1.442695, %v2428_v31  ;;  %v5660_v47 = vadd.f32 %v5659_v35, %v5299_v42 }
 0x3d4   : > { %v2443_v59 = vmul.f32 1.442695, %v2427_v13  ;;  %v5662_v1 = vadd.f32 %v5661_v30, %v2345_v41  ;;  %v5224_v33 = vpop.f32.mrb[6].mxu0 }
 0x3d5   : > { %5873 = vpow2.f32 %v2445_v27  ;;  %v2430_v29 = vsub.f32 0.0, %v5660_v47  ;;  %v5663_v2 = vadd.f32 %v5224_v33, %v1272_v58  ;;  %v5302_v36 = vpop.f32.mrb[4].mxu1  ;;  %v1826_v37 = vpop.f32.mrb[7].mxu0  ;;  %v1279_v58 = vld [vmem:[%s7640_s4 + $0x60] sm:$0xff] }
 0x3d6   : > { %5875 = vpow2.f32 %v2443_v59  ;;  %v2429_v49 = vsub.f32 0.0, %v5662_v1  ;;  %v5665_v52 = vadd.f32 %v1826_v37, %v1271_v53  ;;  %v2357_v61 = vpop.f32.mrb[5].mxu1 }
 0x3d7   : > { %v2449_v4 = vmul.f32 1.442695, %v2430_v29  ;;  %v5664_v19 = vadd.f32 %v5663_v2, %v5302_v36 }
 0x3d8   : > { %v2447_v56 = vmul.f32 1.442695, %v2429_v49  ;;  %v5666_v10 = vadd.f32 %v5665_v52, %v2357_v61  ;;  %v5227_v9 = vpop.f32.mrb[8].mxu0 }
 0x3d9   : > { %5877 = vpow2.f32 %v2449_v4  ;;  %v2432_v32 = vsub.f32 0.0, %v5664_v19  ;;  %v5667_v17 = vadd.f32 %v5227_v9, %v1274_v3  ;;  %v5305_v7 = vpop.f32.mrb[6].mxu1  ;;  %v1840_v39 = vpop.f32.mrb[9].mxu0  ;;  %v1282_v3 = vld [vmem:[%s7640_s4 + $0x78] sm:$0xff] }
 0x3da   : > { %5879 = vpow2.f32 %v2447_v56  ;;  %v2431_v15 = vsub.f32 0.0, %v5666_v10  ;;  %v5669_v51 = vadd.f32 %v1840_v39, %v1273_v16  ;;  %v2369_v6 = vpop.f32.mrb[7].mxu1  ;;  %v1281_v56 = vld [vmem:[%s7640_s4 + $0x70] sm:$0xff] }
 0x3db   : > { %v2453_v20 = vmul.f32 1.442695, %v2432_v32  ;;  %v5668_v14 = vadd.f32 %v5667_v17, %v5305_v7 }
 0x3dc   : > { %v2451_v22 = vmul.f32 1.442695, %v2431_v15  ;;  %v5670_v11 = vadd.f32 %v5669_v51, %v2369_v6  ;;  %v5230_v43 = vpop.f32.mrb[10].mxu0 }
 0x3dd   : > { %5881 = vpow2.f32 %v2453_v20  ;;  %v2434_v50 = vsub.f32 0.0, %v5668_v14  ;;  %v5671_v60 = vadd.f32 %v5230_v43, %v1276_v34  ;;  %v5308_v26 = vpop.f32.mrb[8].mxu1  ;;  %v1854_v63 = vpop.f32.mrb[11].mxu0 }
 0x3de   : > { %5883 = vpow2.f32 %v2451_v22  ;;  %v2433_v5 = vsub.f32 0.0, %v5670_v11  ;;  %v5673_v23 = vadd.f32 %v1854_v63, %v1275_v18  ;;  %v2381_v25 = vpop.f32.mrb[9].mxu1 }
 0x3df   : > { %v5874_v24 = vpop.eup %5873  ;;  %v2457_v44 = vmul.f32 1.442695, %v2434_v50  ;;  %v5672_v45 = vadd.f32 %v5671_v60, %v5308_v26 }
 0x3e0   : > { %v5876_v62 = vpop.eup %5875  ;;  %v2476_v40 = vadd.f32 1.0, %v5874_v24  ;;  %v2455_v0 = vmul.f32 1.442695, %v2433_v5  ;;  %v5674_v21 = vadd.f32 %v5673_v23, %v2381_v25  ;;  %v5233_v12 = vpop.f32.mrb[12].mxu0 }
 0x3e1   : > { %5885 = vpow2.f32 %v2457_v44  ;;  %v2436_v38 = vsub.f32 0.0, %v5672_v45  ;;  %v5675_v48 = vadd.f32 %v5233_v12, %v1278_v28  ;;  %v5311_v55 = vpop.f32.mrb[10].mxu1  ;;  %v1868_v46 = vpop.f32.mrb[13].mxu0  ;;  %v2475_v57 = vadd.f32 1.0, %v5876_v62 }
 0x3e2   : > { %5887 = vrcp.f32 %v2476_v40  ;;  %v2435_v31 = vsub.f32 0.0, %v5674_v21  ;;  %v5677_v35 = vadd.f32 %v1868_v46, %v1277_v54  ;;  %v2393_v42 = vpop.f32.mrb[11].mxu1 }
 0x3e3   : > { %v5878_v13 = vpop.eup %5877  ;;  %v2461_v30 = vmul.f32 1.442695, %v2436_v38  ;;  %v5676_v41 = vadd.f32 %v5675_v48, %v5311_v55  ;;  %5889 = vpow2.f32 %v2455_v0 }
 0x3e4   : > { %v5880_v27 = vpop.eup %5879  ;;  %v2459_v47 = vmul.f32 1.442695, %v2435_v31  ;;  %v5678_v53 = vadd.f32 %v5677_v35, %v2393_v42  ;;  %v5236_v59 = vpop.f32.mrb[14].mxu0  ;;  %v2478_v37 = vadd.f32 1.0, %v5878_v13 }
 0x3e5   : > { %v2477_v1 = vadd.f32 1.0, %v5880_v27  ;;  %5891 = vpow2.f32 %v2461_v30  ;;  %v2438_v33 = vsub.f32 0.0, %v5676_v41  ;;  %v5679_v29 = vadd.f32 %v5236_v59, %v1280_v8  ;;  %v5314_v2 = vpop.f32.mrb[12].mxu1  ;;  %v1882_v36 = vpop.f32.mrb[15].mxu0 }
 0x3e6   : > { %5893 = vrcp.f32 %v2475_v57  ;;  %v2437_v49 = vsub.f32 0.0, %v5678_v53  ;;  %v5681_v52 = vadd.f32 %v1882_v36, %v1279_v58  ;;  %v2405_v61 = vpop.f32.mrb[13].mxu1  ;;  %v6817_v58 = vpop.permute.xlu1 %2891 }
 0x3e7   : > { %v5882_v4 = vpop.eup %5881  ;;  %5895 = vrcp.f32 %v2477_v1  ;;  %v2465_v19 = vmul.f32 1.442695, %v2438_v33  ;;  %v5680_v16 = vadd.f32 %v5679_v29, %v5314_v2 }
 0x3e8   : > { %v5884_v10 = vpop.eup %5883  ;;  %5897 = vpow2.f32 %v2459_v47  ;;  %v2463_v9 = vmul.f32 1.442695, %v2437_v49  ;;  %v5682_v32 = vadd.f32 %v5681_v52, %v2405_v61  ;;  %v5239_v17 = vpop.f32.mrb[16].mxu0  ;;  %v2480_v34 = vadd.f32 1.0, %v5882_v4  ;;  %v2525_v4 = vld [vmem:[%s7641_s5] sm:$0xff] }
 0x3e9   : > { %v2479_v7 = vadd.f32 1.0, %v5884_v10  ;;  %5899 = vpow2.f32 %v2465_v19  ;;  %v2440_v39 = vsub.f32 0.0, %v5680_v16  ;;  %v5683_v15 = vadd.f32 %v5239_v17, %v1282_v3  ;;  %v5317_v51 = vpop.f32.mrb[14].mxu1  ;;  %v1896_v6 = vpop.f32.mrb[17].mxu0  ;;  %v2643_v16 = vld [vmem:[%s7642_s6] sm:$0xff]  ;;  %v2644_v10 = vld [vmem:[%s7642_s6 + $0x8] sm:$0xff] }
 0x3ea   : > { %5901 = vrcp.f32 %v2478_v37  ;;  %v2439_v20 = vsub.f32 0.0, %v5682_v32  ;;  %v5685_v14 = vadd.f32 %v1896_v6, %v1281_v56  ;;  %v2417_v18 = vpop.f32.mrb[15].mxu1  ;;  %v6819_v29 = vpop.permute.xlu1 %2896  ;;  %v2526_v56 = vld [vmem:[%s7641_s5 + $0x8] sm:$0xff]  ;;  %v2527_v32 = vld [vmem:[%s7641_s5 + $0x10] sm:$0xff]  ;;  %v2647_v6 = vld [vmem:[%s7642_s6 + $0x20] sm:$0xff] }
 0x3eb   : > { %v5886_v22 = vpop.eup %5885  ;;  %5903 = vrcp.f32 %v2479_v7  ;;  %v2469_v11 = vmul.f32 1.442695, %v2440_v39  ;;  %v5684_v43 = vadd.f32 %v5683_v15, %v5317_v51  ;;  %v2645_v17 = vld [vmem:[%s7642_s6 + $0x10] sm:$0xff]  ;;  %v2528_v7 = vld [vmem:[%s7641_s5 + $0x18] sm:$0xff]  ;;  %v2529_v51 = vld [vmem:[%s7641_s5 + $0x20] sm:$0xff] }
 0x3ec   : > { %v5888_v50 = vpop.eup %5887  ;;  %5905 = vpow2.f32 %v2463_v9  ;;  %v2467_v60 = vmul.f32 1.442695, %v2439_v20  ;;  %v5686_v26 = vadd.f32 %v5685_v14, %v2417_v18  ;;  %v2482_v23 = vadd.f32 1.0, %v5886_v22  ;;  %v2646_v15 = vld [vmem:[%s7642_s6 + $0x18] sm:$0xff]  ;;  %v2530_v20 = vld [vmem:[%s7641_s5 + $0x28] sm:$0xff]  ;;  %v3004_v18 = vpop.permute.xlu0 %3003  ;;  %v2531_v22 = vld [vmem:[%s7641_s5 + $0x30] sm:$0xff] }
 0x3ed   : > { %5907 = vpow2.f32 %v2469_v11  ;;  %v2442_v63 = vsub.f32 0.0, %v5684_v43  ;;  %2784 = vperm.xlu1 %5871, %v5888_v50   ;;  %v5890_v5 = vpop.eup %5889  ;;  %v2648_v14 = vld [vmem:[%s7642_s6 + $0x28] sm:$0xff]  ;;  %v2649_v43 = vld [vmem:[%s7642_s6 + $0x30] sm:$0xff]  ;;  %v2532_v50 = vld [vmem:[%s7641_s5 + $0x38] sm:$0xff] }
 0x3ee   : > { %5909 = vrcp.f32 %v2480_v34  ;;  %v2441_v25 = vsub.f32 0.0, %v5686_v26  ;;  %v2481_v24 = vadd.f32 1.0, %v5890_v5  ;;  %v6821_v52 = vpop.permute.xlu1 %3008  ;;  %v2651_v5 = vld [vmem:[%s7642_s6 + $0x40] sm:$0xff] }
 0x3ef   : > { %v5892_v28 = vpop.eup %5891  ;;  %5911 = vpow2.f32 %v2467_v60  ;;  %v2473_v44 = vmul.f32 1.442695, %v2442_v63  ;;  %v2650_v60 = vld [vmem:[%s7642_s6 + $0x38] sm:$0xff] }
 0x3f0   : > { %v5894_v45 = vpop.eup %5893  ;;  %v2471_v54 = vmul.f32 1.442695, %v2441_v25  ;;  %5913 = vrcp.f32 %v2481_v24  ;;  %v2484_v0 = vadd.f32 1.0, %v5892_v28  ;;  %v3024_v26 = vpop.permute.xlu0 %3023 }
 0x3f1   : > { %v5896_v62 = vpop.eup %5895  ;;  %2779 = vperm.xlu1 %5871, %v5894_v45   ;;  %5915 = vrcp.f32 %v2482_v23  ;;  %v2533_v23 = vld [vmem:[%s7641_s5 + $0x40] sm:$0xff] }
 0x3f2   : > { %v5898_v40 = vpop.eup %5897  ;;  %2789 = vperm.xlu0 %5872, %v5896_v62   ;;  %5917 = vpow2.f32 %v2473_v44  ;;  %v6826_v19 = vpop.permute.xlu1 %2901 }
 0x3f3   : > { %v5900_v21 = vpop.eup %5899  ;;  %v2483_v12 = vadd.f32 1.0, %v5898_v40  ;;  %5919 = vpow2.f32 %v2471_v54 }
 0x3f4   : > { %v5902_v38 = vpop.eup %5901  ;;  %v2486_v46 = vadd.f32 1.0, %v5900_v21  ;;  %v2917_v25 = vpop.permute.xlu0 %2916 }
 0x3f5   : > { %v5904_v48 = vpop.eup %5903  ;;  %5921 = vrcp.f32 %v2483_v12  ;;  %2794 = vperm.xlu1 %5871, %v5902_v38  }
 0x3f6   : > { %v5906_v55 = vpop.eup %5905  ;;  %5923 = vrcp.f32 %v2484_v0  ;;  %2799 = vperm.xlu0 %5872, %v5904_v48   ;;  %v6837_v9 = vpop.permute.xlu1 %3013 }
 0x3f7   : > { %v5908_v57 = vpop.eup %5907  ;;  %v2485_v31 = vadd.f32 1.0, %v5906_v55 }
 0x3f8   : > { %v5910_v35 = vpop.eup %5909  ;;  %v2488_v8 = vadd.f32 1.0, %v5908_v57  ;;  %v3034_v24 = vpop.permute.xlu0 %3033 }
 0x3f9   : > { %v5912_v42 = vpop.eup %5911  ;;  %5925 = vrcp.f32 %v2485_v31  ;;  %2804 = vperm.xlu1 %5871, %v5910_v35   ;;  %v2523_v35 = vld [vmem:[%s7646_s10] sm:$0x1] }
 0x3fa   : > { %5927 = vrcp.f32 %v2486_v46  ;;  %v2487_v13 = vadd.f32 1.0, %v5912_v42  ;;  %v5914_v30 = vpop.eup %5913  ;;  %v6848_v39 = vpop.permute.xlu1 %2906  ;;  %v2622_v46 = vlaneseq }
 0x3fb   : > { %v5916_v41 = vpop.eup %5915  ;;  %2809 = vperm.xlu0 %5872, %v5914_v30  }
 0x3fc   : > { %5929 = vrcp.f32 %v2487_v13  ;;  %v5918_v27 = vpop.eup %5917  ;;  %v2927_v45 = vpop.permute.xlu0 %2926  ;;  %v2623_v57 = vshrl.u32 %v2622_v46, 7  ;;  %v2524_v13 = vsub.f32 1.0, %v2523_v35 }
 0x3fd   : > { %2814 = vperm.xlu1 %5871, %v5916_v41   ;;  %v5920_v47 = vpop.eup %5919  ;;  %5931 = vrcp.f32 %v2488_v8  ;;  %v2490_v53 = vadd.f32 1.0, %v5918_v27 }
 0x3fe   : > { %v2489_v1 = vadd.f32 1.0, %v5920_v47  ;;  %v3019_v34 = vpop.permute.xlu1 %3018  ;;  %v2624_v8 = vsub.s32 0, %v2623_v57 }
 0x3ff   : > { %v5922_v59 = vpop.eup %5921 }
 0x400   : > { %v5924_v33 = vpop.eup %5923  ;;  %2819 = vperm.xlu0 %5872, %v5922_v59   ;;  %5933 = vrcp.f32 %v2489_v1  ;;  %v3044_v62 = vpop.permute.xlu0 %3043  ;;  %v6904_v27 = vrot.slane %v2523_v35, %v2624_v8  ;;  %v6906_v47 = vrot.slane %v2524_v13, %v2624_v8 }
 0x401   : > { %2824 = vperm.xlu1 %5871, %v5924_v33   ;;  %5935 = vrcp.f32 %v2490_v53 }
 0x402   : > { %v2912_v11 = vpop.permute.xlu1 %2911  ;;  %v2970_v53 = vmul.f32 %v6819_v29, %v6904_v27  ;;  %v3082_v59 = vmul.f32 %v6821_v52, %v6906_v47  ;;  %v2971_v29 = vmul.f32 %v6826_v19, %v6904_v27  ;;  %v3083_v52 = vmul.f32 %v6837_v9, %v6906_v47 }
 0x403   : > { %v5926_v2 = vpop.eup %5925  ;;  %v2973_v19 = vmul.f32 %v2912_v11, %v6904_v27  ;;  %v2976_v11 = vmul.f32 %v2927_v45, %v6904_v27 }
 0x404   : > { %v5928_v36 = vpop.eup %5927  ;;  %2829 = vperm.xlu0 %5872, %v5926_v2   ;;  %v2937_v0 = vpop.permute.xlu0 %2936  ;;  %v2969_v2 = vmul.f32 %v6817_v58, %v6904_v27  ;;  %v3084_v58 = vmul.f32 %v3019_v34, %v6906_v47 }
 0x405   : > { %2834 = vperm.xlu1 %5871, %v5928_v36   ;;  %v3081_v36 = vmul.f32 %v3004_v18, %v6906_v47  ;;  %v3087_v18 = vmul.f32 %v3034_v24, %v6906_v47 }
 0x406   : > { %v5930_v37 = vpop.eup %5929  ;;  %v3029_v63 = vpop.permute.xlu1 %3028 }
 0x407   : > { %v5932_v49 = vpop.eup %5931  ;;  %v3086_v9 = vmul.f32 %v3029_v63, %v6906_v47 }
 0x408   : > { %2839 = vperm.xlu0 %5872, %v5930_v37   ;;  %v6885_v12 = vpop.permute.xlu0 %3053  ;;  %v3098_v37 = vadd.f32 %v3082_v59, %v2970_v53 }
 0x409   : > { %2844 = vperm.xlu1 %5871, %v5932_v49  }
 0x40a   : > { %v5934_v61 = vpop.eup %5933  ;;  %v2922_v28 = vpop.permute.xlu1 %2921 }
 0x40b   : > { %v5936_v3 = vpop.eup %5935 }
 0x40c   : > { %2849 = vperm.xlu0 %5872, %v5934_v61   ;;  %v6889_v48 = vpop.permute.xlu0 %2946 }
 0x40d   : > { %2854 = vperm.xlu1 %5871, %v5936_v3   ;;  %v2980_v35 = vmul.f32 %v6889_v48, %v6904_v27 }
 0x40e   : > { %v3039_v44 = vpop.permute.xlu1 %3038 }
 0x410   : > { %2543 = vperm.xlu0 %5872, %v2525_v4   ;;  %v6893_v31 = vpop.permute.xlu0 %3063  ;;  %v2972_v4 = vmul.f32 %v6848_v39, %v6904_v27  ;;  %v3099_v39 = vadd.f32 %v3083_v52, %v2971_v29 }
 0x411   : > { %2661 = vperm.xlu1 %5871, %v2643_v16   ;;  %v3097_v16 = vadd.f32 %v3081_v36, %v2969_v2  ;;  %v3093_v48 = vmul.f32 %v6893_v31, %v6906_v47 }
 0x412   : > { %v2932_v54 = vpop.permute.xlu1 %2931 }
 0x414   : > { %2548 = vperm.xlu0 %5872, %v2526_v56   ;;  %v6900_v30 = vpop.permute.xlu0 %2956 }
 0x415   : > { %2666 = vperm.xlu1 %5871, %v2644_v10   ;;  %v2982_v36 = vmul.f32 %v6900_v30, %v6904_v27 }
 0x416   : > { %v3049_v40 = vpop.permute.xlu1 %3048 }
 0x418   : > { %2553 = vperm.xlu0 %5872, %v2527_v32   ;;  %v6912_v1 = vpop.permute.xlu0 %3073 }
 0x419   : > { %2671 = vperm.xlu1 %5871, %v2645_v17   ;;  %v3085_v17 = vmul.f32 %v3024_v26, %v6906_v47  ;;  %v3095_v30 = vmul.f32 %v6912_v1, %v6906_v47 }
 0x41a   : > { %v6883_v21 = vpop.permute.xlu1 %2941 }
 0x41c   : > { %2558 = vperm.xlu0 %5872, %v2528_v7   ;;  %v6921_v61 = vpop.permute.xlu0 %2966  ;;  %v2974_v7 = vmul.f32 %v2917_v25, %v6904_v27  ;;  %v3090_v25 = vmul.f32 %v3049_v40, %v6906_v47  ;;  %v3091_v40 = vmul.f32 %v6885_v12, %v6906_v47 }
 0x41d   : > { %2676 = vperm.xlu1 %5871, %v2646_v15   ;;  %v3100_v15 = vadd.f32 %v3084_v58, %v2972_v4  ;;  %v2984_v58 = vmul.f32 %v6921_v61, %v6904_v27 }
 0x41e   : > { %v6887_v38 = vpop.permute.xlu1 %3058 }
 0x420   : > { %2563 = vperm.xlu0 %5872, %v2529_v51  }
 0x421   : > { %2681 = vperm.xlu1 %5871, %v2647_v6  }
 0x422   : > { %v6891_v55 = vpop.permute.xlu1 %2951 }
 0x424   : > { %2568 = vperm.xlu0 %5872, %v2530_v20  }
 0x425   : > { %2686 = vperm.xlu1 %5871, %v2648_v14   ;;  %v2975_v14 = vmul.f32 %v2922_v28, %v6904_v27  ;;  %v2978_v28 = vmul.f32 %v2937_v0, %v6904_v27  ;;  %v3092_v0 = vmul.f32 %v6887_v38, %v6906_v47  ;;  %v2981_v38 = vmul.f32 %v6891_v55, %v6904_v27 }
 0x426   : > { %v6898_v42 = vpop.permute.xlu1 %3068 }
 0x427   : > { %v3103_v24 = vadd.f32 %v3087_v18, %v2975_v14  ;;  %v3106_v53 = vadd.f32 %v3090_v25, %v2978_v28  ;;  %v3094_v2 = vmul.f32 %v6898_v42, %v6906_v47  ;;  %v3108_v29 = vadd.f32 %v3092_v0, %v2980_v35  ;;  %v2652_v14 = vld [vmem:[%s7642_s6 + $0x48] sm:$0xff] }
 0x428   : > { %2573 = vperm.xlu0 %5872, %v2531_v22   ;;  %v3088_v22 = vmul.f32 %v3039_v44, %v6906_v47  ;;  %v2534_v18 = vld [vmem:[%s7641_s5 + $0x48] sm:$0xff] }
 0x429   : > { %2691 = vperm.xlu1 %5871, %v2649_v43   ;;  %v3101_v43 = vadd.f32 %v3085_v17, %v2973_v19  ;;  %v3110_v19 = vadd.f32 %v3094_v2, %v2982_v36 }
 0x42a   : > { %v6902_v41 = vpop.permute.xlu1 %2961  ;;  %v3104_v45 = vadd.f32 %v3088_v22, %v2976_v11 }
 0x42b   : > { %v2983_v42 = vmul.f32 %v6902_v41, %v6904_v27 }
 0x42c   : > { %2578 = vperm.xlu0 %5872, %v2532_v50   ;;  %v3102_v50 = vadd.f32 %v3086_v9, %v2974_v7 }
 0x42d   : > { %2696 = vperm.xlu1 %5871, %v2650_v60   ;;  %v3111_v9 = vadd.f32 %v3095_v30, %v2983_v42 }
 0x42e   : > { %v6914_v33 = vpop.permute.xlu1 %3078 }
 0x42f   : > { %v3096_v4 = vmul.f32 %v6914_v33, %v6906_v47 }
 0x430   : > { %2701 = vperm.xlu0 %5872, %v2651_v5   ;;  %v2977_v5 = vmul.f32 %v2932_v54, %v6904_v27 }
 0x431   : > { %2583 = vperm.xlu1 %5871, %v2533_v23   ;;  %v3089_v23 = vmul.f32 %v3044_v62, %v6906_v47  ;;  %v2979_v62 = vmul.f32 %v6883_v21, %v6904_v27  ;;  %v3112_v7 = vadd.f32 %v3096_v4, %v2984_v58 }
 0x433   : > { %v3105_v8 = vadd.f32 %v3089_v23, %v2977_v5  ;;  %v2653_v5 = vld [vmem:[%s7642_s6 + $0x50] sm:$0xff] }
 0x46c   : > { %v6919_v49 = vpop.permute.xlu1 %2784 }
 0x46d   : > { %v3114_v3 = vmul.f32 %v3098_v37, %v6919_v49  ;;  %v3107_v37 = vadd.f32 %v3091_v40, %v2979_v62  ;;  %v2536_v62 = vld [vmem:[%s7641_s5 + $0x58] sm:$0xff] }
 0x46f   : > { %3163 = vrot.lane.b32.xlu1 %v3114_v3, %s5966_s29 }
 0x470   : > { %v6932_v56 = vpop.permute.xlu1 %2779 }
 0x471   : > { %v3113_v10 = vmul.f32 %v3097_v16, %v6932_v56  ;;  %v6935_v32 = vpop.permute.xlu0 %2789  ;;  %v3109_v16 = vadd.f32 %v3093_v48, %v2981_v38 }
 0x472   : > { %v3115_v6 = vmul.f32 %v3099_v39, %v6935_v32 }
 0x473   : > { %3161 = vrot.lane.b32.xlu0 %v3113_v10, %s5966_s29 }
 0x474   : > { %v6942_v51 = vpop.permute.xlu1 %2794 }
 0x475   : > { %v3116_v34 = vmul.f32 %v3100_v15, %v6942_v51  ;;  %v6946_v20 = vpop.permute.xlu0 %2799 }
 0x476   : > { %v3117_v26 = vmul.f32 %v3101_v43, %v6946_v20 }
 0x477   : > { %3167 = vrot.lane.b32.xlu1 %v3116_v34, %s5966_s29  ;;  %3165 = vrot.lane.b32.xlu0 %v3115_v6, %s5966_s29 }
 0x478   : > { %v6954_v60 = vpop.permute.xlu1 %2804 }
 0x479   : > { %v3118_v63 = vmul.f32 %v3102_v50, %v6954_v60 }
 0x47a   : > { %v6962_v44 = vpop.permute.xlu0 %2809 }
 0x47b   : > { %3171 = vrot.lane.b32.xlu1 %v3118_v63, %s5966_s29  ;;  %3169 = vrot.lane.b32.xlu0 %v3117_v26, %s5966_s29  ;;  %v3119_v57 = vmul.f32 %v3103_v24, %v6962_v44  ;;  %v2535_v63 = vld [vmem:[%s7641_s5 + $0x50] sm:$0xff] }
 0x47c   : > { %v6966_v46 = vpop.permute.xlu1 %2814 }
 0x47d   : > { %v3120_v54 = vmul.f32 %v3104_v45, %v6966_v46 }
 0x47f   : > { %v6978_v13 = vpop.permute.xlu0 %2819  ;;  %3175 = vrot.lane.b32.xlu1 %v3120_v54, %s5966_s29  ;;  %3173 = vrot.lane.b32.xlu0 %v3119_v57, %s5966_s29  ;;  %v2654_v54 = vld [vmem:[%s7642_s6 + $0x58] sm:$0xff] }
 0x480   : > { %v6982_v59 = vpop.permute.xlu1 %2824  ;;  %v3121_v21 = vmul.f32 %v3105_v8, %v6978_v13 }
 0x481   : > { %v3122_v12 = vmul.f32 %v3106_v53, %v6982_v59 }
 0x483   : > { %v6994_v3 = vpop.permute.xlu0 %2829  ;;  %3179 = vrot.lane.b32.xlu1 %v3122_v12, %s5966_s29  ;;  %3177 = vrot.lane.b32.xlu0 %v3121_v21, %s5966_s29  ;;  %v2537_v21 = vld [vmem:[%s7641_s5 + $0x60] sm:$0xff] }
 0x484   : > { %v6998_v52 = vpop.permute.xlu1 %2834  ;;  %v3123_v55 = vmul.f32 %v3107_v37, %v6994_v3  ;;  %v2655_v12 = vld [vmem:[%s7642_s6 + $0x60] sm:$0xff] }
 0x485   : > { %v3124_v31 = vmul.f32 %v3108_v29, %v6998_v52  ;;  %v2656_v29 = vld [vmem:[%s7642_s6 + $0x68] sm:$0xff] }
 0x487   : > { %v7010_v10 = vpop.permute.xlu0 %2839  ;;  %3183 = vrot.lane.b32.xlu1 %v3124_v31, %s5966_s29  ;;  %3181 = vrot.lane.b32.xlu0 %v3123_v55, %s5966_s29  ;;  %v2538_v55 = vld [vmem:[%s7641_s5 + $0x68] sm:$0xff] }
 0x488   : > { %v7014_v17 = vpop.permute.xlu1 %2844  ;;  %v3125_v41 = vmul.f32 %v3109_v16, %v7010_v10  ;;  %v2539_v16 = vld [vmem:[%s7641_s5 + $0x70] sm:$0xff] }
 0x489   : > { %v3126_v1 = vmul.f32 %v3110_v19, %v7014_v17  ;;  %v2657_v19 = vld [vmem:[%s7642_s6 + $0x70] sm:$0xff] }
 0x48b   : > { %v7018_v33 = vpop.permute.xlu0 %2849  ;;  %3187 = vrot.lane.b32.xlu1 %v3126_v1, %s5966_s29  ;;  %3185 = vrot.lane.b32.xlu0 %v3125_v41, %s5966_s29 }
 0x48c   : > { %v7022_v61 = vpop.permute.xlu1 %2854  ;;  %v3127_v39 = vmul.f32 %v3111_v9, %v7018_v33 }
 0x48d   : > { %v3128_v15 = vmul.f32 %v3112_v7, %v7022_v61 }
 0x48f   : > { %v2544_v6 = vpop.permute.xlu0 %2543  ;;  %3191 = vrot.lane.b32.xlu1 %v3128_v15, %s5966_s29  ;;  %3189 = vrot.lane.b32.xlu0 %v3127_v39, %s5966_s29  ;;  %v2658_v15 = vld [vmem:[%s7642_s6 + $0x78] sm:$0xff] }
 0x490   : > { %v2662_v34 = vpop.permute.xlu1 %2661  ;;  %v2627_v22 = vmul.f32 %v6904_v27, %v2544_v6  ;;  %v2540_v6 = vld [vmem:[%s7641_s5 + $0x78] sm:$0xff] }
 0x491   : > { %v2745_v11 = vmul.f32 %v6906_v47, %v2662_v34 }
 0x493   : > { %v2761_v43 = vadd.f32 %v2745_v11, %v2627_v22  ;;  %v2549_v50 = vpop.permute.xlu0 %2548  ;;  %2706 = vperm.xlu1 %5871, %v2652_v14   ;;  %2588 = vperm.xlu0 %5872, %v2534_v18  }
 0x494   : > { %v2667_v26 = vpop.permute.xlu1 %2666  ;;  %v2628_v23 = vmul.f32 %v6904_v27, %v2549_v50 }
 0x495   : > { %v2746_v25 = vmul.f32 %v6906_v47, %v2667_v26  ;;  %v7045_v28 = vmul.f32 %v6932_v56, %v2761_v43  ;;  %v3305_v26 = vld [vmem:[%s7647_s11] sm:$0xff] }
 0x497   : > { %v2762_v24 = vadd.f32 %v2746_v25, %v2628_v23  ;;  %v2554_v45 = vpop.permute.xlu0 %2553  ;;  %2593 = vperm.xlu1 %5871, %v2535_v63   ;;  %2711 = vperm.xlu0 %5872, %v2653_v5   ;;  %v3306_v63 = vld [vmem:[%s7647_s11 + $0x8] sm:$0xff]  ;;  %v3452_v5 = vand.u32 4294901760, %v3305_v26 }
 0x498   : > { %v2672_v57 = vpop.permute.xlu1 %2671  ;;  %v2629_v40 = vmul.f32 %v6904_v27, %v2554_v45  ;;  %v3455_v23 = vand.u32 4294901760, %v3306_v63 }
 0x499   : > { %v2747_v0 = vmul.f32 %v6906_v47, %v2672_v57  ;;  %v7056_v56 = vmul.f32 %v6919_v49, %v2762_v24 }
 0x49a   : > { %v7113_v57 = vpack.c.bf16 %v3455_v23, %v3452_v5 }
 0x49b   : > { %v2763_v35 = vadd.f32 %v2747_v0, %v2629_v40  ;;  %v2559_v8 = vpop.permute.xlu0 %2558  ;;  %2716 = vperm.xlu1 %5871, %v2654_v54   ;;  %2598 = vperm.xlu0 %5872, %v2536_v62  }
 0x49c   : > { %v2677_v53 = vpop.permute.xlu1 %2676  ;;  %v2630_v38 = vmul.f32 %v6904_v27, %v2559_v8  ;;  %5631 = vmatprep.subr.bf16.mxu1 %v7113_v57  ;;  %v7126_v8 = vld [vmem:[%s6048_s26 + $0x8] sm:$0xff] }
 0x49d   : > { %v2748_v48 = vmul.f32 %v6906_v47, %v2677_v53  ;;  %v7067_v49 = vmul.f32 %v6935_v32, %v2763_v35  ;;  %5633 = vmatpush3.bf16.msra.mxu1 %v7113_v57 }
 0x49f   : > { %v2764_v2 = vadd.f32 %v2748_v48, %v2630_v38  ;;  %v2564_v36 = vpop.permute.xlu0 %2563  ;;  %2603 = vperm.xlu1 %5871, %v2537_v21   ;;  %2721 = vperm.xlu0 %5872, %v2655_v12  }
 0x4a0   : > { %v2682_v37 = vpop.permute.xlu1 %2681  ;;  %v2631_v31 = vmul.f32 %v6904_v27, %v2564_v36  ;;  %v7140_v36 = vld [vmem:[%s6048_s26 + $0x10] sm:$0xff] }
 0x4a1   : > { %v2749_v42 = vmul.f32 %v6906_v47, %v2682_v37  ;;  %v7078_v32 = vmul.f32 %v6942_v51, %v2764_v2 }
 0x4a3   : > { %v2765_v30 = vadd.f32 %v2749_v42, %v2631_v31  ;;  %v2569_v4 = vpop.permute.xlu0 %2568  ;;  %2726 = vperm.xlu1 %5871, %v2656_v29   ;;  %2608 = vperm.xlu0 %5872, %v2538_v55   ;;  %v7146_v31 = vld [vmem:[%s6048_s26 + $0x28] sm:$0xff] }
 0x4a4   : > { %v2687_v58 = vpop.permute.xlu1 %2686  ;;  %v2632_v41 = vmul.f32 %v6904_v27, %v2569_v4 }
 0x4a5   : > { %v2750_v1 = vmul.f32 %v6906_v47, %v2687_v58  ;;  %v7089_v51 = vmul.f32 %v6946_v20, %v2765_v30  ;;  %v7150_v30 = vld [vmem:[%s6048_s26 + $0x20] sm:$0xff] }
 0x4a7   : > { %v2766_v9 = vadd.f32 %v2750_v1, %v2632_v41  ;;  %v2574_v7 = vpop.permute.xlu0 %2573  ;;  %2613 = vperm.xlu1 %5871, %v2539_v16   ;;  %2731 = vperm.xlu0 %5872, %v2657_v19   ;;  %v7156_v19 = vld [vmem:[%s6048_s26 + $0x38] sm:$0xff]  ;;  %v7160_v1 = vld [vmem:[%s6048_s26 + $0x30] sm:$0xff] }
 0x4a8   : > { %v2692_v39 = vpop.permute.xlu1 %2691  ;;  %v2633_v34 = vmul.f32 %v6904_v27, %v2574_v7  ;;  %v7165_v7 = vsub.f32 %v3305_v26, %v3452_v5 }
 0x4a9   : > { %v2751_v14 = vmul.f32 %v6906_v47, %v2692_v39  ;;  %v7100_v20 = vmul.f32 %v6954_v60, %v2766_v9  ;;  %v7167_v39 = vsub.f32 %v3306_v63, %v3455_v23  ;;  %v7188_v23 = vld [vmem:[%s6048_s26 + $0x58] sm:$0xff] }
 0x4ab   : > { %v2767_v18 = vadd.f32 %v2751_v14, %v2633_v34  ;;  %v2579_v22 = vpop.permute.xlu0 %2578  ;;  %2736 = vperm.xlu1 %5871, %v2658_v15   ;;  %2618 = vperm.xlu0 %5872, %v2540_v6   ;;  %v7170_v34 = vld [vmem:[%s6048_s26 + $0x48] sm:$0xff] }
 0x4ac   : > { %v2697_v11 = vpop.permute.xlu1 %2696  ;;  %v2634_v43 = vmul.f32 %v6904_v27, %v2579_v22 }
 0x4ad   : > { %v2752_v50 = vmul.f32 %v6906_v47, %v2697_v11  ;;  %v7111_v60 = vmul.f32 %v6962_v44, %v2767_v18  ;;  %v7174_v18 = vld [vmem:[%s6048_s26 + $0x40] sm:$0xff]  ;;  %v7650_v11 = vand.u32 4294901760, %v7165_v7 }
 0x4af   : > { %v2768_v25 = vadd.f32 %v2752_v50, %v2634_v43  ;;  %v2702_v24 = vpop.permute.xlu0 %2701  ;;  %v7649_v43 = vand.u32 4294901760, %v7167_v39  ;;  %v3682_v50 = vsub.f32 %v7165_v7, %v7650_v11 }
 0x4b0   : > { %v2584_v45 = vpop.permute.xlu1 %2583  ;;  %v2753_v54 = vmul.f32 %v6906_v47, %v2702_v24  ;;  %v7192_v24 = vld [vmem:[%s6048_s26 + $0x50] sm:$0xff] }
 0x4b1   : > { %v2635_v62 = vmul.f32 %v6904_v27, %v2584_v45  ;;  %v7118_v40 = vmul.f32 %v6966_v46, %v2768_v25  ;;  %v7131_v46 = vld [vmem:[%s6048_s26] sm:$0xff]  ;;  %v3689_v26 = vsub.f32 %v7167_v39, %v7649_v43 }
 0x4b3   : > { %v2769_v44 = vadd.f32 %v2753_v54, %v2635_v62  ;;  %v3683_v54 = vand.u32 4294901760, %v3682_v50  ;;  %v3690_v62 = vand.u32 4294901760, %v3689_v26  ;;  %v3313_v50 = vld [vmem:[%s7645_s9 + $0x30] sm:$0xff]  ;;  %v3316_v26 = vld [vmem:[%s7645_s9 + $0x48] sm:$0xff] }
 0x4b5   : > { %v7123_v0 = vmul.f32 %v6978_v13, %v2769_v44  ;;  %v7136_v13 = vld [vmem:[%s6048_s26 + $0x18] sm:$0xff]  ;;  %v7197_v44 = vpack.c.bf16 %v3690_v62, %v3683_v54  ;;  %v3319_v54 = vld [vmem:[%s7645_s9 + $0x60] sm:$0xff] }
 0x4b6   : > { %v3322_v62 = vld [vmem:[%s7645_s9 + $0x78] sm:$0xff] }
 0x4b7   : > { %5635 = vmatprep.subr.bf16.mxu1 %v7197_v44 }
 0x4e1   : > { %v3164_v35 = vpop.permute.xlu1 %3163 }
 0x4e2   : > { %v3210_v53 = vmul.f32 %v7126_v8, %v3164_v35 }
 0x4e4   : > { %3243 = vrot.lane.b32.xlu1 %v3210_v53, %s5961_s27 }
 0x4e5   : > { %v3162_v21 = vpop.permute.xlu0 %3161 }
 0x4e6   : > { %v3209_v12 = vmul.f32 %v7131_v46, %v3162_v21  ;;  %v7200_v21 = vld [vmem:[%s6048_s26 + $0x68] sm:$0xff] }
 0x4e8   : > { %3241 = vrot.lane.b32.xlu0 %v3209_v12, %s5961_s27 }
 0x4e9   : > { %v3168_v38 = vpop.permute.xlu1 %3167  ;;  %v3166_v48 = vpop.permute.xlu0 %3165 }
 0x4ea   : > { %v3212_v2 = vmul.f32 %v7136_v13, %v3168_v38  ;;  %v3211_v37 = vmul.f32 %v7140_v36, %v3166_v48  ;;  %v7204_v38 = vld [vmem:[%s6048_s26 + $0x60] sm:$0xff] }
 0x4ec   : > { %3247 = vrot.lane.b32.xlu1 %v3212_v2, %s5961_s27  ;;  %3245 = vrot.lane.b32.xlu0 %v3211_v37, %s5961_s27 }
 0x4ed   : > { %v3172_v29 = vpop.permute.xlu1 %3171  ;;  %v3170_v55 = vpop.permute.xlu0 %3169 }
 0x4ee   : > { %v3214_v42 = vmul.f32 %v7146_v31, %v3172_v29  ;;  %v3213_v4 = vmul.f32 %v7150_v30, %v3170_v55  ;;  %v7211_v29 = vld [vmem:[%s6048_s26 + $0x78] sm:$0xff] }
 0x4f0   : > { %3251 = vrot.lane.b32.xlu1 %v3214_v42, %s5961_s27  ;;  %3249 = vrot.lane.b32.xlu0 %v3213_v4, %s5961_s27  ;;  %v7215_v42 = vld [vmem:[%s6048_s26 + $0x70] sm:$0xff] }
 0x4f1   : > { %v3176_v58 = vpop.permute.xlu1 %3175  ;;  %v3174_v16 = vpop.permute.xlu0 %3173 }
 0x4f2   : > { %v3216_v41 = vmul.f32 %v7156_v19, %v3176_v58  ;;  %v3215_v9 = vmul.f32 %v7160_v1, %v3174_v16  ;;  %v3308_v58 = vld [vmem:[%s7645_s9 + $0x8] sm:$0xff]  ;;  %v3307_v16 = vld [vmem:[%s7645_s9] sm:$0xff] }
 0x4f4   : > { %3255 = vrot.lane.b32.xlu1 %v3216_v41, %s5961_s27  ;;  %3253 = vrot.lane.b32.xlu0 %v3215_v9, %s5961_s27  ;;  %v3310_v41 = vld [vmem:[%s7645_s9 + $0x18] sm:$0xff]  ;;  %v3309_v9 = vld [vmem:[%s7645_s9 + $0x10] sm:$0xff] }
 0x4f5   : > { %v3180_v15 = vpop.permute.xlu1 %3179  ;;  %v3178_v6 = vpop.permute.xlu0 %3177 }
 0x4f6   : > { %v3218_v14 = vmul.f32 %v7170_v34, %v3180_v15  ;;  %v3217_v22 = vmul.f32 %v7174_v18, %v3178_v6  ;;  %v3312_v15 = vld [vmem:[%s7645_s9 + $0x28] sm:$0xff]  ;;  %v3311_v6 = vld [vmem:[%s7645_s9 + $0x20] sm:$0xff] }
 0x4f8   : > { %3259 = vrot.lane.b32.xlu1 %v3218_v14, %s5961_s27  ;;  %3257 = vrot.lane.b32.xlu0 %v3217_v22, %s5961_s27  ;;  %v7240_v14 = vpack.c.bf16 %v7167_v39, %v7165_v7  ;;  %v3314_v22 = vld [vmem:[%s7645_s9 + $0x38] sm:$0xff] }
 0x4f9   : > { %v3184_v63 = vpop.permute.xlu1 %3183  ;;  %v3182_v5 = vpop.permute.xlu0 %3181 }
 0x4fa   : > { %v3220_v25 = vmul.f32 %v7188_v23, %v3184_v63  ;;  %v3219_v45 = vmul.f32 %v7192_v24, %v3182_v5  ;;  %v3315_v63 = vld [vmem:[%s7645_s9 + $0x40] sm:$0xff]  ;;  %v3318_v5 = vld [vmem:[%s7645_s9 + $0x58] sm:$0xff] }
 0x4fc   : > { %3263 = vrot.lane.b32.xlu1 %v3220_v25, %s5961_s27  ;;  %3261 = vrot.lane.b32.xlu0 %v3219_v45, %s5961_s27  ;;  %v3317_v25 = vld [vmem:[%s7645_s9 + $0x50] sm:$0xff]  ;;  %v3320_v45 = vld [vmem:[%s7645_s9 + $0x68] sm:$0xff] }
 0x4fd   : > { %v3188_v35 = vpop.permute.xlu1 %3187  ;;  %v3186_v53 = vpop.permute.xlu0 %3185 }
 0x4fe   : > { %v3222_v12 = vmul.f32 %v7200_v21, %v3188_v35  ;;  %v3221_v48 = vmul.f32 %v7204_v38, %v3186_v53  ;;  %v3321_v35 = vld [vmem:[%s7645_s9 + $0x70] sm:$0xff] }
 0x500   : > { %3267 = vrot.lane.b32.xlu1 %v3222_v12, %s5961_s27  ;;  %3265 = vrot.lane.b32.xlu0 %v3221_v48, %s5961_s27 }
 0x501   : > { %v3192_v2 = vpop.permute.xlu1 %3191  ;;  %v3190_v37 = vpop.permute.xlu0 %3189 }
 0x502   : > { %v3224_v55 = vmul.f32 %v7211_v29, %v3192_v2  ;;  %v3223_v4 = vmul.f32 %v7215_v42, %v3190_v37 }
 0x504   : > { %3271 = vrot.lane.b32.xlu1 %v3224_v55, %s5961_s27  ;;  %3269 = vrot.lane.b32.xlu0 %v3223_v4, %s5961_s27 }
 0x508   : > { %3330 = vperm.xlu1 %5871, %v3308_v58   ;;  %3325 = vperm.xlu0 %5872, %v3307_v16  }
 0x50c   : > { %3340 = vperm.xlu1 %5871, %v3310_v41   ;;  %3335 = vperm.xlu0 %5872, %v3309_v9  }
 0x510   : > { %3350 = vperm.xlu1 %5871, %v3312_v15   ;;  %3345 = vperm.xlu0 %5872, %v3311_v6  }
 0x512   : > { %v2707_v53 = vpop.permute.xlu1 %2706  ;;  %v2589_v12 = vpop.permute.xlu0 %2588 }
 0x514   : > { %3360 = vperm.xlu1 %5871, %v3314_v22   ;;  %3355 = vperm.xlu0 %5872, %v3313_v50   ;;  %v2754_v22 = vmul.f32 %v6906_v47, %v2707_v53  ;;  %v2636_v50 = vmul.f32 %v6904_v27, %v2589_v12 }
 0x516   : > { %v2594_v48 = vpop.permute.xlu1 %2593  ;;  %v2712_v2 = vpop.permute.xlu0 %2711 }
 0x518   : > { %3370 = vperm.xlu1 %5871, %v3316_v26   ;;  %3365 = vperm.xlu0 %5872, %v3315_v63   ;;  %v3130_v26 = vmul.f32 %v7126_v8, %v7056_v56  ;;  %v2637_v63 = vmul.f32 %v6904_v27, %v2594_v48  ;;  %v3129_v56 = vmul.f32 %v7131_v46, %v7045_v28 }
 0x51a   : > { %v2717_v37 = vpop.permute.xlu1 %2716  ;;  %v2599_v55 = vpop.permute.xlu0 %2598 }
 0x51c   : > { %3380 = vperm.xlu1 %5871, %v3318_v5   ;;  %3375 = vperm.xlu0 %5872, %v3317_v25   ;;  %v2755_v5 = vmul.f32 %v6906_v47, %v2712_v2 }
 0x51e   : > { %v2604_v4 = vpop.permute.xlu1 %2603  ;;  %v2722_v58 = vpop.permute.xlu0 %2721  ;;  %v2771_v8 = vadd.f32 %v2755_v5, %v2637_v63 }
 0x51f   : > { %v2639_v53 = vmul.f32 %v6904_v27, %v2604_v4  ;;  %v2757_v12 = vmul.f32 %v6906_v47, %v2722_v58 }
 0x520   : > { %3390 = vperm.xlu1 %5871, %v3320_v45   ;;  %3385 = vperm.xlu0 %5872, %v3319_v54   ;;  %v2770_v54 = vadd.f32 %v2754_v22, %v2636_v50  ;;  %v3131_v22 = vmul.f32 %v7140_v36, %v7067_v49  ;;  %v3134_v49 = vmul.f32 %v7146_v31, %v7100_v20 }
 0x521   : > { %v2773_v58 = vadd.f32 %v2757_v12, %v2639_v53  ;;  %v3133_v36 = vmul.f32 %v7150_v30, %v7089_v51  ;;  %v2867_v63 = vmul.f32 %v6994_v3, %v2771_v8 }
 0x522   : > { %v2727_v16 = vpop.permute.xlu1 %2726  ;;  %v2609_v41 = vpop.permute.xlu0 %2608  ;;  %v2866_v4 = vmul.f32 %v6982_v59, %v2770_v54 }
 0x524   : > { %3400 = vperm.xlu1 %5871, %v3322_v62   ;;  %3395 = vperm.xlu0 %5872, %v3321_v35   ;;  %v2756_v62 = vmul.f32 %v6906_v47, %v2717_v37  ;;  %v2638_v35 = vmul.f32 %v6904_v27, %v2599_v55  ;;  %v3132_v55 = vmul.f32 %v7136_v13, %v7078_v32 }
 0x525   : > { %v3135_v32 = vmul.f32 %v7160_v1, %v7111_v60  ;;  %v3138_v1 = vmul.f32 %v7170_v34, %v2866_v4  ;;  %v3139_v34 = vmul.f32 %v7192_v24, %v2867_v63 }
 0x526   : > { %v2614_v9 = vpop.permute.xlu1 %2613  ;;  %v2732_v15 = vpop.permute.xlu0 %2731  ;;  %v2772_v37 = vadd.f32 %v2756_v62, %v2638_v35 }
 0x528   : > { %v2868_v51 = vmul.f32 %v6998_v52, %v2772_v37 }
 0x52a   : > { %v7272_v6 = vpop.permute.xlu1 %2736  ;;  %v7280_v25 = vpop.permute.xlu0 %2618  ;;  %v3140_v53 = vmul.f32 %v7188_v23, %v2868_v51 }
 0x556   : > { %v3244_v45 = vpop.permute.xlu1 %3243 }
 0x557   : > { %v3290_v43 = vadd.f32 %v3244_v45, %v3130_v26  ;;  %v2640_v26 = vmul.f32 %v6904_v27, %v2609_v41  ;;  %v3136_v41 = vmul.f32 %v7156_v19, %v7118_v40  ;;  %v2869_v45 = vmul.f32 %v7010_v10, %v2773_v58 }
 0x558   : > { %v2641_v40 = vmul.f32 %v6904_v27, %v2614_v9 }
 0x559   : > { %v3407_v11 = vsel %vm430_vm0, %v3290_v43, 0  ;;  %v2758_v43 = vmul.f32 %v6906_v47, %v2727_v16  ;;  %v7346_v24 = vmul.f32 %v7204_v38, %v2869_v45 }
 0x55a   : > { %v7289_v48 = vand.u32 4294901760, %v3407_v11  ;;  %v3242_v2 = vpop.permute.xlu0 %3241 }
 0x55b   : > { %v3289_v50 = vadd.f32 %v3242_v2, %v3129_v56  ;;  %v2774_v30 = vadd.f32 %v2758_v43, %v2640_v26 }
 0x55c   : > { %v7299_v28 = vsub.f32 %v3407_v11, %v7289_v48  ;;  %v3137_v11 = vmul.f32 %v7174_v18, %v7123_v0  ;;  %v2759_v0 = vmul.f32 %v6906_v47, %v2732_v15 }
 0x55d   : > { %v3404_v46 = vsel %vm430_vm0, %v3289_v50, 0  ;;  %v2870_v23 = vmul.f32 %v7014_v17, %v2774_v30 }
 0x55e   : > { %v7308_v59 = vand.u32 4294901760, %v3404_v46  ;;  %v3248_v13 = vpop.permute.xlu1 %3247  ;;  %v3246_v16 = vpop.permute.xlu0 %3245  ;;  %v3530_v20 = vand.u32 4294901760, %v7299_v28  ;;  %v2775_v2 = vadd.f32 %v2759_v0, %v2641_v40 }
 0x55f   : > { %v3292_v31 = vadd.f32 %v3248_v13, %v3132_v55  ;;  %v3291_v5 = vadd.f32 %v3246_v16, %v3131_v22  ;;  %v2760_v13 = vmul.f32 %v6906_v47, %v7272_v6 }
 0x560   : > { %v7318_v60 = vsub.f32 %v3404_v46, %v7308_v59  ;;  %v3531_v10 = vsub.f32 %v7299_v28, %v3530_v20 }
 0x561   : > { %v3413_v3 = vsel %vm430_vm0, %v3292_v31, 0  ;;  %v3410_v19 = vsel %vm430_vm0, %v3291_v5, 0 }
 0x562   : > { %v7326_v18 = vand.u32 4294901760, %v3413_v3  ;;  %v7328_v54 = vand.u32 4294901760, %v3410_v19  ;;  %v3252_v52 = vpop.permute.xlu1 %3251  ;;  %v3250_v62 = vpop.permute.xlu0 %3249  ;;  %v3520_v35 = vand.u32 4294901760, %v7318_v60  ;;  %v3532_v46 = vand.u32 4294901760, %v3531_v10 }
 0x563   : > { %v3294_v9 = vadd.f32 %v3252_v52, %v3134_v49  ;;  %v3293_v15 = vadd.f32 %v3250_v62, %v3133_v36 }
 0x564   : > { %v7337_v12 = vsub.f32 %v3413_v3, %v7326_v18  ;;  %v7340_v56 = vsub.f32 %v3410_v19, %v7328_v54  ;;  %v3521_v8 = vsub.f32 %v7318_v60, %v3520_v35 }
 0x565   : > { %v3419_v22 = vsel %vm430_vm0, %v3294_v9, 0  ;;  %v3416_v37 = vsel %vm430_vm0, %v3293_v15, 0 }
 0x566   : > { %v7351_v50 = vand.u32 4294901760, %v3419_v22  ;;  %v7353_v55 = vand.u32 4294901760, %v3416_v37  ;;  %v3256_v4 = vpop.permute.xlu1 %3255  ;;  %v3254_v58 = vpop.permute.xlu0 %3253  ;;  %v3522_v43 = vand.u32 4294901760, %v3521_v8  ;;  %v3540_v26 = vand.u32 4294901760, %v7340_v56 }
 0x567   : > { %v3296_v49 = vadd.f32 %v3256_v4, %v3136_v41  ;;  %v3295_v38 = vadd.f32 %v3254_v58, %v3135_v32  ;;  %v3550_v36 = vand.u32 4294901760, %v7337_v12  ;;  %v2642_v41 = vmul.f32 %v6904_v27, %v7280_v25 }
 0x568   : > { %v7360_v16 = vsub.f32 %v3419_v22, %v7351_v50  ;;  %v7363_v17 = vsub.f32 %v3416_v37, %v7353_v55  ;;  %5322 = vmatprep.mubr.f32.mxu1 %v3522_v43  ;;  %v3541_v63 = vsub.f32 %v7340_v56, %v3540_v26 }
 0x569   : > { %v3425_v32 = vsel %vm430_vm0, %v3296_v49, 0  ;;  %v3422_v31 = vsel %vm430_vm0, %v3295_v38, 0  ;;  %5323 = vmatmul.mubr.f32.vlgmr.msra.gmra.mrb[16].mxu1 %v3532_v46  ;;  %v3551_v47 = vsub.f32 %v7337_v12, %v3550_v36 }
 0x56a   : > { %v7375_v6 = vand.u32 4294901760, %v3425_v32  ;;  %v7377_v5 = vand.u32 4294901760, %v3422_v31  ;;  %v3260_v51 = vpop.permute.xlu1 %3259  ;;  %v3258_v30 = vpop.permute.xlu0 %3257  ;;  %v3542_v45 = vand.u32 4294901760, %v3541_v63  ;;  %v3560_v40 = vand.u32 4294901760, %v7363_v17  ;;  %5637 = vmatpush3.bf16.msra.mxu1 %v7197_v44 }
 0x56b   : > { %v3298_v27 = vadd.f32 %v3260_v51, %v3138_v1  ;;  %v3297_v25 = vadd.f32 %v3258_v30, %v3137_v11  ;;  %v3552_v0 = vand.u32 4294901760, %v3551_v47  ;;  %v3570_v3 = vand.u32 4294901760, %v7360_v16  ;;  %5639 = vmatprep.subr.bf16.mxu1 %v7240_v14 }
 0x56c   : > { %v7384_v19 = vsub.f32 %v3425_v32, %v7375_v6  ;;  %v7387_v52 = vsub.f32 %v3422_v31, %v7377_v5  ;;  %5325 = vmatprep.mubr.f32.mxu1 %v3542_v45  ;;  %v3561_v62 = vsub.f32 %v7363_v17, %v3560_v40  ;;  %v3142_v44 = vmul.f32 %v7200_v21, %v2870_v23 }
 0x56d   : > { %v2776_v1 = vadd.f32 %v2760_v13, %v2642_v41  ;;  %v3431_v11 = vsel %vm430_vm0, %v3298_v27, 0  ;;  %v3428_v10 = vsel %vm430_vm0, %v3297_v25, 0  ;;  %5326 = vmatmul.mubr.f32.gmra.mrb[18].mxu1 %v3552_v0  ;;  %v3571_v9 = vsub.f32 %v7360_v16, %v3570_v3 }
 0x56e   : > { %v7398_v15 = vand.u32 4294901760, %v3431_v11  ;;  %v7400_v8 = vand.u32 4294901760, %v3428_v10  ;;  %v3264_v22 = vpop.permute.xlu1 %3263  ;;  %v3262_v37 = vpop.permute.xlu0 %3261  ;;  %v3562_v4 = vand.u32 4294901760, %v3561_v62  ;;  %v3580_v58 = vand.u32 4294901760, %v7387_v52 }
 0x56f   : > { %v3300_v21 = vadd.f32 %v3264_v22, %v3140_v53  ;;  %v3299_v23 = vadd.f32 %v3262_v37, %v3139_v34  ;;  %v3572_v43 = vand.u32 4294901760, %v3571_v9  ;;  %v3590_v46 = vand.u32 4294901760, %v7384_v19 }
 0x570   : > { %v7405_v49 = vsub.f32 %v3431_v11, %v7398_v15  ;;  %v7408_v38 = vsub.f32 %v3428_v10, %v7400_v8  ;;  %5328 = vmatprep.mubr.f32.mxu1 %v3562_v4  ;;  %v3581_v13 = vsub.f32 %v7387_v52, %v3580_v58  ;;  %v2871_v63 = vmul.f32 %v7018_v33, %v2775_v2 }
 0x571   : > { %v3437_v41 = vsel %vm430_vm0, %v3300_v21, 0  ;;  %v3434_v34 = vsel %vm430_vm0, %v3299_v23, 0  ;;  %5329 = vmatmul.mubr.f32.gmra.mrb[20].mxu1 %v3572_v43  ;;  %v3591_v53 = vsub.f32 %v7384_v19, %v3590_v46  ;;  %v2872_v32 = vmul.f32 %v7022_v61, %v2776_v1 }
 0x572   : > { %v7420_v31 = vand.u32 4294901760, %v3437_v41  ;;  %v7422_v47 = vand.u32 4294901760, %v3434_v34  ;;  %v3268_v51 = vpop.permute.xlu1 %3267  ;;  %v3266_v30 = vpop.permute.xlu0 %3265  ;;  %v3582_v45 = vand.u32 4294901760, %v3581_v13  ;;  %v3600_v33 = vand.u32 4294901760, %v7408_v38 }
 0x573   : > { %v3302_v2 = vadd.f32 %v3268_v51, %v3142_v44  ;;  %v3301_v27 = vadd.f32 %v3266_v30, %v7346_v24  ;;  %v3592_v25 = vand.u32 4294901760, %v3591_v53  ;;  %v3610_v0 = vand.u32 4294901760, %v7405_v49 }
 0x574   : > { %v7428_v62 = vsub.f32 %v3437_v41, %v7420_v31  ;;  %v7431_v61 = vsub.f32 %v3434_v34, %v7422_v47  ;;  %5331 = vmatprep.mubr.f32.mxu1 %v3582_v45  ;;  %v3143_v1 = vmul.f32 %v7215_v42, %v2871_v63  ;;  %v3601_v11 = vsub.f32 %v7408_v38, %v3600_v33 }
 0x575   : > { %v3443_v44 = vsel %vm430_vm0, %v3302_v2, 0  ;;  %v3440_v24 = vsel %vm430_vm0, %v3301_v27, 0  ;;  %5332 = vmatmul.mubr.f32.gmra.mrb[22].mxu1 %v3592_v25  ;;  %v3144_v10 = vmul.f32 %v7211_v29, %v2872_v32  ;;  %v3611_v9 = vsub.f32 %v7405_v49, %v3610_v0 }
 0x576   : > { %v7443_v22 = vand.u32 4294901760, %v3443_v44  ;;  %v7445_v37 = vand.u32 4294901760, %v3440_v24  ;;  %v3272_v42 = vpop.permute.xlu1 %3271  ;;  %v3270_v4 = vpop.permute.xlu0 %3269  ;;  %v3602_v21 = vand.u32 4294901760, %v3601_v11  ;;  %v3620_v23 = vand.u32 4294901760, %v7431_v61 }
 0x577   : > { %v3304_v43 = vadd.f32 %v3272_v42, %v3144_v10  ;;  %v3303_v13 = vadd.f32 %v3270_v4, %v3143_v1  ;;  %v3612_v63 = vand.u32 4294901760, %v3611_v9  ;;  %v3630_v41 = vand.u32 4294901760, %v7428_v62 }
 0x578   : > { %v7450_v29 = vsub.f32 %v3443_v44, %v7443_v22  ;;  %v7453_v34 = vsub.f32 %v3440_v24, %v7445_v37  ;;  %5334 = vmatprep.mubr.f32.mxu1 %v3602_v21  ;;  %v3621_v53 = vsub.f32 %v7431_v61, %v3620_v23 }
 0x579   : > { %v3449_v32 = vsel %vm430_vm0, %v3304_v43, 0  ;;  %v3446_v51 = vsel %vm430_vm0, %v3303_v13, 0  ;;  %5335 = vmatmul.mubr.f32.gmra.mrb[24].mxu1 %v3612_v63  ;;  %v3631_v30 = vsub.f32 %v7428_v62, %v3630_v41 }
 0x57a   : > { %v7463_v45 = vand.u32 4294901760, %v3449_v32  ;;  %v7465_v2 = vand.u32 4294901760, %v3446_v51  ;;  %v3622_v27 = vand.u32 4294901760, %v3621_v53  ;;  %v3640_v25 = vand.u32 4294901760, %v7453_v34 }
 0x57b   : > { %v3632_v1 = vand.u32 4294901760, %v3631_v30  ;;  %v3650_v11 = vand.u32 4294901760, %v7450_v29 }
 0x57c   : > { %v7470_v44 = vsub.f32 %v3449_v32, %v7463_v45  ;;  %v7473_v24 = vsub.f32 %v3446_v51, %v7465_v2  ;;  %5337 = vmatprep.mubr.f32.mxu1 %v3622_v27  ;;  %v3641_v10 = vsub.f32 %v7453_v34, %v3640_v25  ;;  %v7652_v51 = vand.u32 4294901760, %v7167_v39 }
 0x57d   : > { %5338 = vmatmul.mubr.f32.gmra.mrb[26].mxu1 %v3632_v1  ;;  %v3651_v9 = vsub.f32 %v7450_v29, %v3650_v11 }
 0x57e   : > { %v3642_v42 = vand.u32 4294901760, %v3641_v10  ;;  %v3660_v4 = vand.u32 4294901760, %v7473_v24  ;;  %v3670_v21 = vand.u32 4294901760, %v7470_v44 }
 0x57f   : > { %v3652_v43 = vand.u32 4294901760, %v3651_v9 }
 0x580   : > { %5340 = vmatprep.mubr.f32.mxu1 %v3642_v42  ;;  %v3661_v13 = vsub.f32 %v7473_v24, %v3660_v4  ;;  %v3671_v63 = vsub.f32 %v7470_v44, %v3670_v21 }
 0x581   : > { %5341 = vmatmul.mubr.f32.gmra.mrb[28].mxu1 %v3652_v43 }
 0x582   : > { %v3662_v53 = vand.u32 4294901760, %v3661_v13  ;;  %v3672_v32 = vand.u32 4294901760, %v3671_v63 }
 0x584   : > { %5343 = vmatprep.mubr.f32.mxu1 %v3662_v53 }
 0x585   : > { %5344 = vmatmul.mubr.f32.gmra.mrb[30].mxu1 %v3672_v32 }
 0x586   : > { %5350 = vmatprep.mubr.f32.mxu1 %v7308_v59 }
 0x589   : > { %5351 = vmatmul.mubr.f32.vlgmr.msra.gmra.mrb[16].mxu1 %v7289_v48 }
 0x58a   : > { %5353 = vmatprep.mubr.f32.mxu1 %v7328_v54  ;;  %5641 = vmatpush3.bf16.msra.mxu1 %v7240_v14  ;;  %v7651_v14 = vand.u32 4294901760, %v7165_v7  ;;  %v3326_v7 = vpop.permute.xlu0 %3325 }
 0x58b   : > { %5643 = vmatprep.subr.bf16.mxu1 %v7113_v57 }
 0x58c   : > { %v5646_v30 = vpack.c.bf16 %v7652_v51, %v7651_v14 }
 0x58d   : > { %5354 = vmatmul.mubr.f32.gmra.mrb[18].mxu1 %v7326_v18 }
 0x58e   : > { %5356 = vmatprep.mubr.f32.mxu1 %v7353_v55 }
 0x591   : > { %5357 = vmatmul.mubr.f32.gmra.mrb[20].mxu1 %v7351_v50 }
 0x592   : > { %5359 = vmatprep.mubr.f32.mxu1 %v7377_v5 }
 0x595   : > { %5360 = vmatmul.mubr.f32.gmra.mrb[22].mxu1 %v7375_v6 }
 0x596   : > { %5362 = vmatprep.mubr.f32.mxu1 %v7400_v8 }
 0x599   : > { %5363 = vmatmul.mubr.f32.gmra.mrb[24].mxu1 %v7398_v15 }
 0x59a   : > { %5365 = vmatprep.mubr.f32.mxu1 %v7422_v47 }
 0x59d   : > { %5366 = vmatmul.mubr.f32.gmra.mrb[26].mxu1 %v7420_v31 }
 0x59e   : > { %5368 = vmatprep.mubr.f32.mxu1 %v7445_v37 }
 0x5a1   : > { %5369 = vmatmul.mubr.f32.gmra.mrb[28].mxu1 %v7443_v22 }
 0x5a2   : > { %5371 = vmatprep.mubr.f32.mxu1 %v7465_v2 }
 0x5a5   : > { %5372 = vmatmul.mubr.f32.gmra.mrb[30].mxu1 %v7463_v45 }
 0x5a6   : > { %5378 = vmatprep.mubr.f32.mxu1 %v7318_v60 }
 0x5a9   : > { %5379 = vmatmul.mubr.f32.vlgmr.msra.gmra.mrb[16].mxu1 %v7299_v28 }
 0x5aa   : > { %5381 = vmatprep.mubr.f32.mxu1 %v7340_v56  ;;  %5645 = vmatpush3.bf16.msra.mxu1 %v7113_v57 }
 0x5ab   : > { %5647 = vmatprep.subr.bf16.mxu1 %v5646_v30 }
 0x5ad   : > { %5382 = vmatmul.mubr.f32.gmra.mrb[18].mxu1 %v7337_v12 }
 0x5ae   : > { %5384 = vmatprep.mubr.f32.mxu1 %v7363_v17 }
 0x5b1   : > { %5385 = vmatmul.mubr.f32.gmra.mrb[20].mxu1 %v7360_v16 }
 0x5b2   : > { %5387 = vmatprep.mubr.f32.mxu1 %v7387_v52 }
 0x5b5   : > { %5388 = vmatmul.mubr.f32.gmra.mrb[22].mxu1 %v7384_v19 }
 0x5b6   : > { %5390 = vmatprep.mubr.f32.mxu1 %v7408_v38 }
 0x5b9   : > { %5391 = vmatmul.mubr.f32.gmra.mrb[24].mxu1 %v7405_v49 }
 0x5ba   : > { %5393 = vmatprep.mubr.f32.mxu1 %v7431_v61 }
 0x5bd   : > { %5394 = vmatmul.mubr.f32.gmra.mrb[26].mxu1 %v7428_v62 }
 0x5be   : > { %5396 = vmatprep.mubr.f32.mxu1 %v7453_v34 }
 0x5c1   : > { %5397 = vmatmul.mubr.f32.gmra.mrb[28].mxu1 %v7450_v29 }
 0x5c2   : > { %5399 = vmatprep.mubr.f32.mxu1 %v7473_v24 }
 0x5c5   : > { %5400 = vmatmul.mubr.f32.gmra.mrb[30].mxu1 %v7470_v44 }
 0x5c6   : > { %5406 = vmatprep.mubr.f32.mxu1 %v3520_v35 }
 0x5c9   : > { %5407 = vmatmul.mubr.f32.vlgmr.msra.gmra.mrb[16].mxu1 %v3530_v20 }
 0x5ca   : > { %5409 = vmatprep.mubr.f32.mxu1 %v3540_v26  ;;  %5649 = vmatpush3.bf16.msra.mxu1 %v5646_v30 }
 0x5cb   : > { %5651 = vmatprep.subr.bf16.mxu1 %v7113_v57 }
 0x5cd   : > { %5410 = vmatmul.mubr.f32.gmra.mrb[18].mxu1 %v3550_v36 }
 0x5ce   : > { %5412 = vmatprep.mubr.f32.mxu1 %v3560_v40 }
 0x5d1   : > { %5413 = vmatmul.mubr.f32.gmra.mrb[20].mxu1 %v3570_v3 }
 0x5d2   : > { %5415 = vmatprep.mubr.f32.mxu1 %v3580_v58 }
 0x5d5   : > { %5416 = vmatmul.mubr.f32.gmra.mrb[22].mxu1 %v3590_v46 }
 0x5d6   : > { %5418 = vmatprep.mubr.f32.mxu1 %v3600_v33 }
 0x5d9   : > { %5419 = vmatmul.mubr.f32.gmra.mrb[24].mxu1 %v3610_v0 }
 0x5da   : > { %5421 = vmatprep.mubr.f32.mxu1 %v3620_v23 }
 0x5dd   : > { %5422 = vmatmul.mubr.f32.gmra.mrb[26].mxu1 %v3630_v41 }
 0x5de   : > { %5424 = vmatprep.mubr.f32.mxu1 %v3640_v25 }
 0x5e1   : > { %5425 = vmatmul.mubr.f32.gmra.mrb[28].mxu1 %v3650_v11 }
 0x5e2   : > { %5427 = vmatprep.mubr.f32.mxu1 %v3660_v4 }
 0x5e5   : > { %5428 = vmatmul.mubr.f32.gmra.mrb[30].mxu1 %v3670_v21 }
 0x5e6   : > { %5434 = vmatprep.mubr.f32.mxu1 %v7308_v59 }
 0x5e9   : > { %5435 = vmatmul.mubr.f32.vlgmr.msra.gmra.mrb[16].mxu1 %v7289_v48 }
 0x5ea   : > { %5437 = vmatprep.mubr.f32.mxu1 %v7328_v54  ;;  %5653 = vmatpush3.bf16.msra.mxu1 %v7113_v57  ;;  %v3331_v57 = vpop.permute.xlu1 %3330 }
 0x5ed   : > { %5438 = vmatmul.mubr.f32.gmra.mrb[18].mxu1 %v7326_v18 }
 0x5ee   : > { %5440 = vmatprep.mubr.f32.mxu1 %v7353_v55  ;;  %v3341_v39 = vpop.permute.xlu1 %3340 }
 0x5f1   : > { %5441 = vmatmul.mubr.f32.gmra.mrb[20].mxu1 %v7351_v50 }
 0x5f2   : > { %5443 = vmatprep.mubr.f32.mxu1 %v7377_v5  ;;  %v3351_v28 = vpop.permute.xlu1 %3350 }
 0x5f5   : > { %5444 = vmatmul.mubr.f32.gmra.mrb[22].mxu1 %v7375_v6 }
 0x5f6   : > { %5446 = vmatprep.mubr.f32.mxu1 %v7400_v8  ;;  %v3361_v35 = vpop.permute.xlu1 %3360 }
 0x5f9   : > { %5447 = vmatmul.mubr.f32.gmra.mrb[24].mxu1 %v7398_v15 }
 0x5fa   : > { %5449 = vmatprep.mubr.f32.mxu1 %v7422_v47 }
 0x5fd   : > { %5450 = vmatmul.mubr.f32.gmra.mrb[26].mxu1 %v7420_v31 }
 0x5fe   : > { %5452 = vmatprep.mubr.f32.mxu1 %v7445_v37 }
 0x601   : > { %5453 = vmatmul.mubr.f32.gmra.mrb[28].mxu1 %v7443_v22 }
 0x602   : > { %5455 = vmatprep.mubr.f32.mxu1 %v7465_v2 }
 0x605   : > { %5456 = vmatmul.mubr.f32.gmra.mrb[30].mxu1 %v7463_v45 }
 0x606   : > { %5462 = vmatprep.mubr.f32.mxu1 %v7308_v59 }
 0x609   : > { %5463 = vmatmul.mubr.f32.vlgmr.msra.gmra.mrb[16].mxu1 %v7289_v48  ;;  %v3336_v48 = vpop.permute.xlu0 %3335 }
 0x60a   : > { %5465 = vmatprep.mubr.f32.mxu1 %v7328_v54 }
 0x60d   : > { %5466 = vmatmul.mubr.f32.gmra.mrb[18].mxu1 %v7326_v18  ;;  %v3346_v59 = vpop.permute.xlu0 %3345 }
 0x60e   : > { %5468 = vmatprep.mubr.f32.mxu1 %v7353_v55 }
 0x611   : > { %5469 = vmatmul.mubr.f32.gmra.mrb[20].mxu1 %v7351_v50  ;;  %v3356_v56 = vpop.permute.xlu0 %3355 }
 0x612   : > { %5471 = vmatprep.mubr.f32.mxu1 %v7377_v5 }
 0x615   : > { %5472 = vmatmul.mubr.f32.gmra.mrb[22].mxu1 %v7375_v6  ;;  %v3371_v6 = vpop.permute.xlu1 %3370  ;;  %v3366_v40 = vpop.permute.xlu0 %3365 }
 0x616   : > { %5474 = vmatprep.mubr.f32.mxu1 %v7400_v8 }
 0x619   : > { %5475 = vmatmul.mubr.f32.gmra.mrb[24].mxu1 %v7398_v15  ;;  %v3381_v8 = vpop.permute.xlu1 %3380  ;;  %v3376_v46 = vpop.permute.xlu0 %3375 }
 0x61a   : > { %5477 = vmatprep.mubr.f32.mxu1 %v7422_v47 }
 0x61d   : > { %5478 = vmatmul.mubr.f32.gmra.mrb[26].mxu1 %v7420_v31  ;;  %v3391_v62 = vpop.permute.xlu1 %3390 }
 0x61e   : > { %5480 = vmatprep.mubr.f32.mxu1 %v7445_v37 }
 0x621   : > { %5481 = vmatmul.mubr.f32.gmra.mrb[28].mxu1 %v7443_v22  ;;  %v3386_v22 = vpop.permute.xlu0 %3385  ;;  %v3401_v34 = vpop.permute.xlu1 %3400 }
 0x622   : > { %5483 = vmatprep.mubr.f32.mxu1 %v7465_v2 }
 0x625   : > { %5484 = vmatmul.mubr.f32.gmra.mrb[30].mxu1 %v7463_v45  ;;  %v3396_v2 = vpop.permute.xlu0 %3395 }
 0x6dc   : > { %v5464_v20 = vpop.f32.mrb[16].mxu1 }
 0x6dd   : > { %v5687_v60 = vadd.f32 %v5464_v20, %v3331_v57  ;;  %v4461_v18 = vpop.f32.mrb[17].mxu1 }
 0x6de   : > { %v5688_v54 = vadd.f32 %v4461_v18, %v3326_v7 }
 0x6df   : > { %4557 = vst.msk [vmem:[%s7599_s25 + $0x8] sm:$0xff] %vm4555_vm4, %v5687_v60 }
 0x6e0   : > { %4556 = vst.msk [vmem:[%s7599_s25] sm:$0xff] %vm4555_vm4, %v5688_v54  ;;  %v5467_v12 = vpop.f32.mrb[18].mxu1 }
 0x6e1   : > { %v5689_v50 = vadd.f32 %v5467_v12, %v3341_v39  ;;  %v4473_v55 = vpop.f32.mrb[19].mxu1 }
 0x6e2   : > { %v5690_v26 = vadd.f32 %v4473_v55, %v3336_v48 }
 0x6e3   : > { %4559 = vst.msk [vmem:[%s7599_s25 + $0x18] sm:$0xff] %vm4555_vm4, %v5689_v50 }
 0x6e4   : > { %4558 = vst.msk [vmem:[%s7599_s25 + $0x10] sm:$0xff] %vm4555_vm4, %v5690_v26  ;;  %v5470_v36 = vpop.f32.mrb[20].mxu1 }
 0x6e5   : > { %v5691_v16 = vadd.f32 %v5470_v36, %v3351_v28  ;;  %v4485_v17 = vpop.f32.mrb[21].mxu1 }
 0x6e6   : > { %v5692_v5 = vadd.f32 %v4485_v17, %v3346_v59 }
 0x6e7   : > { %4561 = vst.msk [vmem:[%s7599_s25 + $0x28] sm:$0xff] %vm4555_vm4, %v5691_v16 }
 0x6e8   : > { %4560 = vst.msk [vmem:[%s7599_s25 + $0x20] sm:$0xff] %vm4555_vm4, %v5692_v5  ;;  %v5473_v3 = vpop.f32.mrb[22].mxu1 }
 0x6e9   : > { %v5693_v19 = vadd.f32 %v5473_v3, %v3361_v35  ;;  %v4497_v52 = vpop.f32.mrb[23].mxu1 }
 0x6ea   : > { %v5694_v15 = vadd.f32 %v4497_v52, %v3356_v56 }
 0x6eb   : > { %4563 = vst.msk [vmem:[%s7599_s25 + $0x38] sm:$0xff] %vm4555_vm4, %v5693_v19 }
 0x6ec   : > { %4562 = vst.msk [vmem:[%s7599_s25 + $0x30] sm:$0xff] %vm4555_vm4, %v5694_v15  ;;  %v5476_v58 = vpop.f32.mrb[24].mxu1 }
 0x6ed   : > { %v5695_v49 = vadd.f32 %v5476_v58, %v3371_v6  ;;  %v4509_v38 = vpop.f32.mrb[25].mxu1 }
 0x6ee   : > { %v5696_v31 = vadd.f32 %v4509_v38, %v3366_v40 }
 0x6ef   : > { %4565 = vst.msk [vmem:[%s7599_s25 + $0x48] sm:$0xff] %vm4555_vm4, %v5695_v49 }
 0x6f0   : > { %4564 = vst.msk [vmem:[%s7599_s25 + $0x40] sm:$0xff] %vm4555_vm4, %v5696_v31  ;;  %v5479_v47 = vpop.f32.mrb[26].mxu1 }
 0x6f1   : > { %v5697_v33 = vadd.f32 %v5479_v47, %v3381_v8  ;;  %v4521_v0 = vpop.f32.mrb[27].mxu1 }
 0x6f2   : > { %v5698_v61 = vadd.f32 %v4521_v0, %v3376_v46 }
 0x6f3   : > { %4567 = vst.msk [vmem:[%s7599_s25 + $0x58] sm:$0xff] %vm4555_vm4, %v5697_v33 }
 0x6f4   : > { %4566 = vst.msk [vmem:[%s7599_s25 + $0x50] sm:$0xff] %vm4555_vm4, %v5698_v61  ;;  %v5482_v37 = vpop.f32.mrb[28].mxu1 }
 0x6f5   : > { %v5699_v23 = vadd.f32 %v5482_v37, %v3391_v62  ;;  %v4533_v41 = vpop.f32.mrb[29].mxu1 }
 0x6f6   : > { %v5700_v29 = vadd.f32 %v4533_v41, %v3386_v22 }
 0x6f7   : > { %4569 = vst.msk [vmem:[%s7599_s25 + $0x68] sm:$0xff] %vm4555_vm4, %v5699_v23 }
 0x6f8   : > { %4568 = vst.msk [vmem:[%s7599_s25 + $0x60] sm:$0xff] %vm4555_vm4, %v5700_v29  ;;  %v5485_v45 = vpop.f32.mrb[30].mxu1 }
 0x6f9   : > { %v5701_v27 = vadd.f32 %v5485_v45, %v3401_v34  ;;  %v4545_v25 = vpop.f32.mrb[31].mxu1 }
 0x6fa   : > { %v5702_v1 = vadd.f32 %v4545_v25, %v3396_v2 }
 0x6fb   : > { %4571 = vst.msk [vmem:[%s7599_s25 + $0x78] sm:$0xff] %vm4555_vm4, %v5701_v27 }
 0x6fc   : > { %4570 = vst.msk [vmem:[%s7599_s25 + $0x70] sm:$0xff] %vm4555_vm4, %v5702_v1 }
 0x6fd PF: > { %s22_s21 = sadd.s32 1, %s5959_s21  }
 0x6fe   : > { %p19_p4 = scmp.ge.s32.totalorder %s22_s21, 4  }
 0x700   :  { %21 = sbr.rel (!%p19_p4) target bundleno = 1 (0x1), region = 98 }

</bundles_post_ra>
